<compile_context>
chip_gen: v5e
topology: v5e:2x2
jax: 0.10.0
libtpu: 0.0.40
codegen_flags: <defaults>
</compile_context>

<pallas_src>
import jax
import jax.numpy as jnp
from jax.experimental import pallas as pl
from jax.experimental.pallas import tpu as pltpu

NUM_DENSE = 16            # num_dense_feature
NUM_SPARSE = 2            # number of embedding columns (module uses exactly 2)
EMB_DIM = 8
VOCAB0, VOCAB1 = 10, 42
VOCAB0_PAD, VOCAB1_PAD = 16, 48     # padded vocab sizes (multiples of 16 for bf16 sublanes)
H1, H2, H3 = 256, 128, 64
NUM_FEATURE = NUM_DENSE + NUM_SPARSE * EMB_DIM      # Deep input_dim (32)

# Merged layer-1 RHS layout (rows of the (K1, tb) scratch / columns of the merged weight):
#   [ 0:16)  one-hot(id0)            (padded vocab 10 -> 16)
#   [16:64)  one-hot(id1)            (padded vocab 42 -> 48)
#   [64:80)  dense features
#   [80:96)  ones  (column 80 of the weight holds b1, columns 81..95 are zero)
K1 = VOCAB0_PAD + VOCAB1_PAD + NUM_DENSE + 16       # 96


def wide_deep_kernel(x_ref, w1m_ref, w2_ref, b2_ref, w3_ref, b3_ref,
                     wwide_ref, wf_ref, btot_ref, out_ref, x1_scratch):
    # x_ref: (18, TB) f32 -- rows 0:16 dense features, rows 16:18 sparse ids (exact ints)
    x = x_ref[...]
    tb = x.shape[1]

    dense = x[0:NUM_DENSE, :]                                   # (16, TB) f32
    ids0 = x[NUM_DENSE:NUM_DENSE + 1, :].astype(jnp.int32)      # (1, TB)
    ids1 = x[NUM_DENSE + 1:NUM_DENSE + 2, :].astype(jnp.int32)  # (1, TB)

    # One-hot encodings with vocab on the sublane axis, batch on lanes.
    iota0 = jax.lax.broadcasted_iota(jnp.int32, (VOCAB0_PAD, tb), 0)
    iota1 = jax.lax.broadcasted_iota(jnp.int32, (VOCAB1_PAD, tb), 0)

    # Assemble the merged layer-1 RHS in bf16 VMEM scratch (all slice starts are
    # multiples of 16 rows -> aligned bf16 sublane tiles).
    x1_scratch[0:VOCAB0_PAD, :] = (iota0 == ids0).astype(jnp.bfloat16)
    x1_scratch[VOCAB0_PAD:VOCAB0_PAD + VOCAB1_PAD, :] = (iota1 == ids1).astype(jnp.bfloat16)
    x1_scratch[64:80, :] = dense.astype(jnp.bfloat16)
    x1_scratch[80:96, :] = jnp.ones((16, tb), jnp.bfloat16)     # bias row (+ zero-weight pad rows)

    # Layer 1: single K=96 matmul with embeddings, dense slice and b1 all fused in.
    h = jnp.dot(w1m_ref[...], x1_scratch[...],
                preferred_element_type=jnp.float32)             # (256, TB) f32
    h = jnp.maximum(h, 0.0)

    h = jnp.dot(w2_ref[...], h.astype(jnp.bfloat16),
                preferred_element_type=jnp.float32) + b2_ref[...]   # (128, TB)
    h = jnp.maximum(h, 0.0)
    h = jnp.dot(w3_ref[...], h.astype(jnp.bfloat16),
                preferred_element_type=jnp.float32) + b3_ref[...]   # (64, TB)
    h = jnp.maximum(h, 0.0)

    # Final N=1 projections as cross-sublane reductions (XLU), output stays lane-dense.
    # 0.5 scale and both scalar biases were folded wrapper-side.
    wide = jnp.sum(dense * wwide_ref[...], axis=0, keepdims=True)   # (1, TB)
    deep = jnp.sum(h * wf_ref[...], axis=0, keepdims=True)          # (1, TB)
    z = wide + deep + btot_ref[...]                                 # (1, TB)

    # Numerically-stable sigmoid: exp of non-positive arg (EUP) + approx reciprocal (EUP).
    ez = jnp.exp(-jnp.abs(z))                                       # in (0, 1]
    inv = pl.reciprocal(1.0 + ez, approx=True)
    out_ref[...] = jnp.where(z >= 0.0, inv, ez * inv).astype(out_ref.dtype)


def wide_deep_forward(x, params, *, tb=512):
    """x: [B, NUM_DENSE + NUM_SPARSE]; last 2 columns hold sparse ids (as floats).

    tb: batch tile (lane axis).  Keep it a multiple of 256 (MXU width on v6e/v7x)
    and, for v7x megacore, pick tb so that b_pad // tb >= 2.  Sweep 512..2048.
    """
    (emb0, emb1, w_wide, b_wide, w1, b1, w2, b2, w3, b3, wf, bf) = params
    B = x.shape[0]

    # Pad the batch up to a multiple of the tile size (padded rows carry id 0, a valid
    # embedding row; padded outputs are sliced off below).
    b_pad = ((B + tb - 1) // tb) * tb
    x_pad = x if b_pad == B else jnp.pad(x, ((0, b_pad - B), (0, 0)))

    # Transposed (feature-major) input: batch on the lane axis; sparse ids ride along
    # as rows 16-17 (small non-negative ints are exact in f32).
    x_t = x_pad.T.astype(jnp.float32)                       # (18, Bp)

    # Merged layer-1 weight: fuse embedding tables, dense slice and b1 into one K=96
    # bf16 matrix matching the scratch layout built in-kernel.
    t0 = w1[:, :EMB_DIM] @ emb0.T                           # (256, 10)
    t1 = w1[:, EMB_DIM:2 * EMB_DIM] @ emb1.T                # (256, 42)
    t0 = jnp.pad(t0, ((0, 0), (0, VOCAB0_PAD - VOCAB0)))    # (256, 16)
    t1 = jnp.pad(t1, ((0, 0), (0, VOCAB1_PAD - VOCAB1)))    # (256, 48)
    w1d = w1[:, 2 * EMB_DIM:]                               # (256, 16)
    b1col = b1.reshape(H1, 1)                               # (256, 1)  -> ones row
    zpad = jnp.zeros((H1, 15), jnp.float32)                 # columns 81..95 unused
    w1m = jnp.concatenate([t0, t1, w1d, b1col, zpad], axis=1).astype(jnp.bfloat16)  # (256, 96)

    w2b = w2.astype(jnp.bfloat16)                           # (128, 256)
    w3b = w3.astype(jnp.bfloat16)                           # (64, 128)
    b2c = b2.reshape(H2, 1)
    b3c = b3.reshape(H3, 1)

    # Fold the 0.5 scale into the final weights and combine the two scalar biases.
    wwide_col = (0.5 * w_wide).reshape(NUM_DENSE, 1)        # (16, 1) f32
    wf_col = (0.5 * wf).reshape(H3, 1)                      # (64, 1) f32
    btot = (0.5 * (b_wide.reshape(()) + bf.reshape(()))).reshape(1, 1)

    def const(shape):
        return pl.BlockSpec(shape, lambda i: (0, 0))

    out = pl.pallas_call(
        wide_deep_kernel,
        out_shape=jax.ShapeDtypeStruct((1, b_pad), jnp.float32),
        grid=(b_pad // tb,),
        in_specs=[
            pl.BlockSpec((NUM_DENSE + NUM_SPARSE, tb), lambda i: (0, i)),  # x tile
            const((H1, K1)),                                # merged layer-1 weight
            const((H2, H1)),                                # w2
            const((H2, 1)),                                 # b2
            const((H3, H2)),                                # w3
            const((H3, 1)),                                 # b3
            const((NUM_DENSE, 1)),                          # 0.5 * w_wide
            const((H3, 1)),                                 # 0.5 * wf
            const((1, 1)),                                  # 0.5*(b_wide + bf)
        ],
        out_specs=pl.BlockSpec((1, tb), lambda i: (0, i)),  # lane-dense output slab
        scratch_shapes=[pltpu.VMEM((K1, tb), jnp.bfloat16)],
        compiler_params=pltpu.CompilerParams(
            dimension_semantics=("parallel",)),
    )(x_t, w1m, w2b, b2c, w3b, b3c, wwide_col, wf_col, btot)

    return out[0, :B].reshape(B, 1)


def init_params(key):
    """Parameters in PyTorch orientation: Linear weight is [out, in], bias [out]."""
    ks = jax.random.split(key, 7)

    def linear(k, fan_in, fan_out):
        kw, kb = jax.random.split(k)
        bound = 1.0 / jnp.sqrt(jnp.float32(fan_in))
        W = jax.random.uniform(kw, (fan_out, fan_in), jnp.float32, -bound, bound)
        b = jax.random.uniform(kb, (fan_out,), jnp.float32, -bound, bound)
        return W, b

    emb0 = jax.random.normal(ks[0], (VOCAB0, EMB_DIM), jnp.float32)
    emb1 = jax.random.normal(ks[1], (VOCAB1, EMB_DIM), jnp.float32)
    w_wide, b_wide = linear(ks[2], NUM_DENSE, 1)
    w1, b1 = linear(ks[3], NUM_FEATURE, H1)
    w2, b2 = linear(ks[4], H1, H2)
    w3, b3 = linear(ks[5], H2, H3)
    wf, bf = linear(ks[6], H3, 1)
    return (emb0, emb1, w_wide, b_wide, w1, b1, w2, b2, w3, b3, wf, bf)


def reference_forward(x, params):
    """Pure-JAX f32 reference mirroring the PyTorch forward."""
    (emb0, emb1, w_wide, b_wide, w1, b1, w2, b2, w3, b3, wf, bf) = params
    dense = x[:, :NUM_DENSE]
    ids = x[:, NUM_DENSE:].astype(jnp.int32)
    e0 = emb0[ids[:, 0]]
    e1 = emb1[ids[:, 1]]
    deep_in = jnp.concatenate([e0, e1, dense], axis=-1)
    wide_out = dense @ w_wide.T + b_wide
    h = jnp.maximum(deep_in @ w1.T + b1, 0.0)
    h = jnp.maximum(h @ w2.T + b2, 0.0)
    h = jnp.maximum(h @ w3.T + b3, 0.0)
    deep_out = h @ wf.T + bf
    return jax.nn.sigmoid(0.5 * (wide_out + deep_out))


if __name__ == "__main__":
    key = jax.random.PRNGKey(0)
    k_param, k_dense, k_s0, k_s1 = jax.random.split(key, 4)

    params = init_params(k_param)

    # Two batch tiles of 512 -> exercises the parallel grid / pipelining.
    B = 1024
    dense = jax.random.normal(k_dense, (B, NUM_DENSE), jnp.float32)
    idx0 = jax.random.randint(k_s0, (B, 1), 0, VOCAB0).astype(jnp.float32)
    idx1 = jax.random.randint(k_s1, (B, 1), 0, VOCAB1).astype(jnp.float32)
    x = jnp.concatenate([dense, idx0, idx1], axis=-1)   # [B, 18]

    out = jax.block_until_ready(wide_deep_forward(x, params))
    ref = jax.block_until_ready(reference_forward(x, params))
    assert out.shape == (B, 1)
    # bf16 matmul operands (f32 accumulation) -> small drift vs f32 reference.
    assert jnp.allclose(out, ref, atol=2e-2, rtol=0.0), float(jnp.max(jnp.abs(out - ref)))

    # Ragged batch (exercises padding path).
    Bs = 300
    xs = x[:Bs]
    outs = jax.block_until_ready(wide_deep_forward(xs, params))
    refs = jax.block_until_ready(reference_forward(xs, params))
    assert outs.shape == (Bs, 1)
    assert jnp.allclose(outs, refs, atol=2e-2, rtol=0.0), float(jnp.max(jnp.abs(outs - refs)))

    print("KERNEL_OK")
</pallas_src>

<mosaic_0001>
module attributes {stable_mosaic.version = 11 : i64} {
  func.func @wide_deep_kernel(%arg0: i32, %arg1: memref<18x512xf32, #tpu.memory_space<vmem>>, %arg2: memref<256x96xbf16, #tpu.memory_space<vmem>>, %arg3: memref<128x256xbf16, #tpu.memory_space<vmem>>, %arg4: memref<128x1xf32, #tpu.memory_space<vmem>>, %arg5: memref<64x128xbf16, #tpu.memory_space<vmem>>, %arg6: memref<64x1xf32, #tpu.memory_space<vmem>>, %arg7: memref<16x1xf32, #tpu.memory_space<vmem>>, %arg8: memref<64x1xf32, #tpu.memory_space<vmem>>, %arg9: memref<1x1xf32, #tpu.memory_space<vmem>>, %arg10: memref<1x512xf32, #tpu.memory_space<vmem>>, %arg11: memref<96x512xbf16, #tpu.memory_space<vmem>>) attributes {dimension_semantics = [#tpu.dimension_semantics<parallel>], iteration_bounds = array<i64: 2>, scalar_prefetch = 0 : i64, scratch_operands = 1 : i64, tpu.core_type = #tpu.core_type<tc>, window_params = [{transform_indices = @transform_0, window_bounds = array<i64: 18, 512>}, {pipeline_mode = #tpu.pipeline_mode<synchronous>, transform_indices = @transform_1, window_bounds = array<i64: 256, 96>}, {pipeline_mode = #tpu.pipeline_mode<synchronous>, transform_indices = @transform_2, window_bounds = array<i64: 128, 256>}, {pipeline_mode = #tpu.pipeline_mode<synchronous>, transform_indices = @transform_3, window_bounds = array<i64: 128, 1>}, {pipeline_mode = #tpu.pipeline_mode<synchronous>, transform_indices = @transform_4, window_bounds = array<i64: 64, 128>}, {pipeline_mode = #tpu.pipeline_mode<synchronous>, transform_indices = @transform_5, window_bounds = array<i64: 64, 1>}, {pipeline_mode = #tpu.pipeline_mode<synchronous>, transform_indices = @transform_6, window_bounds = array<i64: 16, 1>}, {pipeline_mode = #tpu.pipeline_mode<synchronous>, transform_indices = @transform_7, window_bounds = array<i64: 64, 1>}, {pipeline_mode = #tpu.pipeline_mode<synchronous>, transform_indices = @transform_8, window_bounds = array<i64: 1, 1>}, {transform_indices = @transform_9, window_bounds = array<i64: 1, 512>}]} {
    %c0 = arith.constant 0 : index
    %c0_0 = arith.constant 0 : index
    %0 = vector.load %arg1[%c0, %c0_0] : memref<18x512xf32, #tpu.memory_space<vmem>>, vector<18x512xf32>
    %1 = vector.extract_strided_slice %0 {offsets = [0, 0], sizes = [16, 512], strides = [1, 1]} : vector<18x512xf32> to vector<16x512xf32>
    %2 = vector.extract_strided_slice %0 {offsets = [16, 0], sizes = [1, 512], strides = [1, 1]} : vector<18x512xf32> to vector<1x512xf32>
    %3 = arith.fptosi %2 : vector<1x512xf32> to vector<1x512xi32>
    %4 = vector.extract_strided_slice %0 {offsets = [17, 0], sizes = [1, 512], strides = [1, 1]} : vector<18x512xf32> to vector<1x512xf32>
    %5 = arith.fptosi %4 : vector<1x512xf32> to vector<1x512xi32>
    %6 = tpu.iota {dimensions = array<i32: 0>} : vector<16x512xi32>
    %7 = tpu.iota {dimensions = array<i32: 0>} : vector<48x512xi32>
    %8 = vector.broadcast %3 : vector<1x512xi32> to vector<16x512xi32>
    %9 = arith.cmpi eq, %6, %8 : vector<16x512xi32>
    %10 = arith.extui %9 : vector<16x512xi1> to vector<16x512xi32>
    %11 = arith.sitofp %10 : vector<16x512xi32> to vector<16x512xf32>
    %12 = arith.truncf %11 : vector<16x512xf32> to vector<16x512xbf16>
    %c0_1 = arith.constant 0 : index
    %c0_2 = arith.constant 0 : index
    %13 = vector.load %arg11[%c0_1, %c0_2] : memref<96x512xbf16, #tpu.memory_space<vmem>>, vector<16x512xbf16>
    tpu.vector_store %arg11[%c0_1, %c0_2], %12 {strides = array<i32>} : memref<96x512xbf16, #tpu.memory_space<vmem>>, vector<16x512xbf16>,
    %14 = vector.broadcast %5 : vector<1x512xi32> to vector<48x512xi32>
    %15 = arith.cmpi eq, %7, %14 : vector<48x512xi32>
    %16 = arith.extui %15 : vector<48x512xi1> to vector<48x512xi32>
    %17 = arith.sitofp %16 : vector<48x512xi32> to vector<48x512xf32>
    %18 = arith.truncf %17 : vector<48x512xf32> to vector<48x512xbf16>
    %c16 = arith.constant 16 : index
    %c0_3 = arith.constant 0 : index
    %19 = vector.load %arg11[%c16, %c0_3] : memref<96x512xbf16, #tpu.memory_space<vmem>>, vector<48x512xbf16>
    tpu.vector_store %arg11[%c16, %c0_3], %18 {strides = array<i32>} : memref<96x512xbf16, #tpu.memory_space<vmem>>, vector<48x512xbf16>,
    %20 = arith.truncf %1 : vector<16x512xf32> to vector<16x512xbf16>
    %c64 = arith.constant 64 : index
    %c0_4 = arith.constant 0 : index
    %21 = vector.load %arg11[%c64, %c0_4] : memref<96x512xbf16, #tpu.memory_space<vmem>>, vector<16x512xbf16>
    tpu.vector_store %arg11[%c64, %c0_4], %20 {strides = array<i32>} : memref<96x512xbf16, #tpu.memory_space<vmem>>, vector<16x512xbf16>,
    %cst = arith.constant 1.000000e+00 : bf16
    %22 = vector.broadcast %cst : bf16 to vector<16x512xbf16>
    %c80 = arith.constant 80 : index
    %c0_5 = arith.constant 0 : index
    %23 = vector.load %arg11[%c80, %c0_5] : memref<96x512xbf16, #tpu.memory_space<vmem>>, vector<16x512xbf16>
    tpu.vector_store %arg11[%c80, %c0_5], %22 {strides = array<i32>} : memref<96x512xbf16, #tpu.memory_space<vmem>>, vector<16x512xbf16>,
    %c0_6 = arith.constant 0 : index
    %c0_7 = arith.constant 0 : index
    %24 = vector.load %arg2[%c0_6, %c0_7] : memref<256x96xbf16, #tpu.memory_space<vmem>>, vector<256x96xbf16>
    %c0_8 = arith.constant 0 : index
    %c0_9 = arith.constant 0 : index
    %25 = vector.load %arg11[%c0_8, %c0_9] : memref<96x512xbf16, #tpu.memory_space<vmem>>, vector<96x512xbf16>
    %cst_10 = arith.constant dense<0.000000e+00> : vector<256x512xf32>
    %26 = tpu.matmul %24, %25, %cst_10 {dimension_numbers = #tpu.dot_dimension_numbers<[1], [0], [0], [1], [0, 0, 1, 1], [], []>} : vector<256x96xbf16>, vector<96x512xbf16>, vector<256x512xf32> -> vector<256x512xf32>
    %cst_11 = arith.constant 0.000000e+00 : f32
    %27 = vector.broadcast %cst_11 : f32 to vector<256x512xf32>
    %28 = arith.maximumf %26, %27 : vector<256x512xf32>
    %c0_12 = arith.constant 0 : index
    %c0_13 = arith.constant 0 : index
    %29 = vector.load %arg3[%c0_12, %c0_13] : memref<128x256xbf16, #tpu.memory_space<vmem>>, vector<128x256xbf16>
    %30 = arith.truncf %28 : vector<256x512xf32> to vector<256x512xbf16>
    %cst_14 = arith.constant dense<0.000000e+00> : vector<128x512xf32>
    %31 = tpu.matmul %29, %30, %cst_14 {dimension_numbers = #tpu.dot_dimension_numbers<[1], [0], [0], [1], [0, 0, 1, 1], [], []>} : vector<128x256xbf16>, vector<256x512xbf16>, vector<128x512xf32> -> vector<128x512xf32>
    %c0_15 = arith.constant 0 : index
    %c0_16 = arith.constant 0 : index
    %32 = vector.load %arg4[%c0_15, %c0_16] : memref<128x1xf32, #tpu.memory_space<vmem>>, vector<128x1xf32>
    %33 = vector.broadcast %32 : vector<128x1xf32> to vector<128x512xf32>
    %34 = arith.addf %31, %33 : vector<128x512xf32>
    %cst_17 = arith.constant 0.000000e+00 : f32
    %35 = vector.broadcast %cst_17 : f32 to vector<128x512xf32>
    %36 = arith.maximumf %34, %35 : vector<128x512xf32>
    %c0_18 = arith.constant 0 : index
    %c0_19 = arith.constant 0 : index
    %37 = vector.load %arg5[%c0_18, %c0_19] : memref<64x128xbf16, #tpu.memory_space<vmem>>, vector<64x128xbf16>
    %38 = arith.truncf %36 : vector<128x512xf32> to vector<128x512xbf16>
    %cst_20 = arith.constant dense<0.000000e+00> : vector<64x512xf32>
    %39 = tpu.matmul %37, %38, %cst_20 {dimension_numbers = #tpu.dot_dimension_numbers<[1], [0], [0], [1], [0, 0, 1, 1], [], []>} : vector<64x128xbf16>, vector<128x512xbf16>, vector<64x512xf32> -> vector<64x512xf32>
    %c0_21 = arith.constant 0 : index
    %c0_22 = arith.constant 0 : index
    %40 = vector.load %arg6[%c0_21, %c0_22] : memref<64x1xf32, #tpu.memory_space<vmem>>, vector<64x1xf32>
    %41 = vector.broadcast %40 : vector<64x1xf32> to vector<64x512xf32>
    %42 = arith.addf %39, %41 : vector<64x512xf32>
    %cst_23 = arith.constant 0.000000e+00 : f32
    %43 = vector.broadcast %cst_23 : f32 to vector<64x512xf32>
    %44 = arith.maximumf %42, %43 : vector<64x512xf32>
    %c0_24 = arith.constant 0 : index
    %c0_25 = arith.constant 0 : index
    %45 = vector.load %arg7[%c0_24, %c0_25] : memref<16x1xf32, #tpu.memory_space<vmem>>, vector<16x1xf32>
    %46 = vector.broadcast %45 : vector<16x1xf32> to vector<16x512xf32>
    %47 = arith.mulf %1, %46 : vector<16x512xf32>
    %cst_26 = arith.constant dense<0.000000e+00> : vector<512xf32>
    %48 = vector.multi_reduction <add>, %47, %cst_26 [0] : vector<16x512xf32> to vector<512xf32>
    %49 = vector.shape_cast %48 : vector<512xf32> to vector<1x512xf32>
    %c0_27 = arith.constant 0 : index
    %c0_28 = arith.constant 0 : index
    %50 = vector.load %arg8[%c0_27, %c0_28] : memref<64x1xf32, #tpu.memory_space<vmem>>, vector<64x1xf32>
    %51 = vector.broadcast %50 : vector<64x1xf32> to vector<64x512xf32>
    %52 = arith.mulf %44, %51 : vector<64x512xf32>
    %cst_29 = arith.constant dense<0.000000e+00> : vector<512xf32>
    %53 = vector.multi_reduction <add>, %52, %cst_29 [0] : vector<64x512xf32> to vector<512xf32>
    %54 = vector.shape_cast %53 : vector<512xf32> to vector<1x512xf32>
    %55 = arith.addf %49, %54 : vector<1x512xf32>
    %c0_30 = arith.constant 0 : index
    %c0_31 = arith.constant 0 : index
    %56 = vector.load %arg9[%c0_30, %c0_31] : memref<1x1xf32, #tpu.memory_space<vmem>>, vector<1x1xf32>
    %57 = vector.broadcast %56 : vector<1x1xf32> to vector<1x512xf32>
    %58 = arith.addf %55, %57 : vector<1x512xf32>
    %59 = math.absf %58 : vector<1x512xf32>
    %cst_32 = arith.constant 0.000000e+00 : f32
    %60 = vector.broadcast %cst_32 : f32 to vector<1x512xf32>
    %61 = arith.subf %60, %59 : vector<1x512xf32>
    %62 = math.exp %61 : vector<1x512xf32>
    %cst_33 = arith.constant 1.000000e+00 : f32
    %63 = vector.broadcast %cst_33 : f32 to vector<1x512xf32>
    %64 = arith.addf %63, %62 : vector<1x512xf32>
    %65 = tpu.reciprocal %64 {approx = true} : vector<1x512xf32> -> vector<1x512xf32>
    %cst_34 = arith.constant 0.000000e+00 : f32
    %66 = vector.broadcast %cst_34 : f32 to vector<1x512xf32>
    %67 = arith.cmpf oge, %58, %66 : vector<1x512xf32>
    %68 = arith.mulf %62, %65 : vector<1x512xf32>
    %69 = arith.select %67, %65, %68 : vector<1x512xi1>, vector<1x512xf32>
    %c0_35 = arith.constant 0 : index
    %c0_36 = arith.constant 0 : index
    %70 = vector.load %arg10[%c0_35, %c0_36] : memref<1x512xf32, #tpu.memory_space<vmem>>, vector<1x512xf32>
    tpu.vector_store %arg10[%c0_35, %c0_36], %69 {strides = array<i32>} : memref<1x512xf32, #tpu.memory_space<vmem>>, vector<1x512xf32>,
    return
  }
  func.func @transform_0(%arg0: i32) -> (i32, i32) {
    %c0_i32 = arith.constant 0 : i32
    %c0_i32_0 = arith.constant 0 : i32
    return %c0_i32, %arg0 : i32, i32
  }
  func.func @transform_1(%arg0: i32) -> (i32, i32) {
    %c0_i32 = arith.constant 0 : i32
    %c0_i32_0 = arith.constant 0 : i32
    %c0_i32_1 = arith.constant 0 : i32
    return %c0_i32, %c0_i32_0 : i32, i32
  }
  func.func @transform_2(%arg0: i32) -> (i32, i32) {
    %c0_i32 = arith.constant 0 : i32
    %c0_i32_0 = arith.constant 0 : i32
    %c0_i32_1 = arith.constant 0 : i32
    return %c0_i32, %c0_i32_0 : i32, i32
  }
  func.func @transform_3(%arg0: i32) -> (i32, i32) {
    %c0_i32 = arith.constant 0 : i32
    %c0_i32_0 = arith.constant 0 : i32
    %c0_i32_1 = arith.constant 0 : i32
    return %c0_i32, %c0_i32_0 : i32, i32
  }
  func.func @transform_4(%arg0: i32) -> (i32, i32) {
    %c0_i32 = arith.constant 0 : i32
    %c0_i32_0 = arith.constant 0 : i32
    %c0_i32_1 = arith.constant 0 : i32
    return %c0_i32, %c0_i32_0 : i32, i32
  }
  func.func @transform_5(%arg0: i32) -> (i32, i32) {
    %c0_i32 = arith.constant 0 : i32
    %c0_i32_0 = arith.constant 0 : i32
    %c0_i32_1 = arith.constant 0 : i32
    return %c0_i32, %c0_i32_0 : i32, i32
  }
  func.func @transform_6(%arg0: i32) -> (i32, i32) {
    %c0_i32 = arith.constant 0 : i32
    %c0_i32_0 = arith.constant 0 : i32
    %c0_i32_1 = arith.constant 0 : i32
    return %c0_i32, %c0_i32_0 : i32, i32
  }
  func.func @transform_7(%arg0: i32) -> (i32, i32) {
    %c0_i32 = arith.constant 0 : i32
    %c0_i32_0 = arith.constant 0 : i32
    %c0_i32_1 = arith.constant 0 : i32
    return %c0_i32, %c0_i32_0 : i32, i32
  }
  func.func @transform_8(%arg0: i32) -> (i32, i32) {
    %c0_i32 = arith.constant 0 : i32
    %c0_i32_0 = arith.constant 0 : i32
    %c0_i32_1 = arith.constant 0 : i32
    return %c0_i32, %c0_i32_0 : i32, i32
  }
  func.func @transform_9(%arg0: i32) -> (i32, i32) {
    %c0_i32 = arith.constant 0 : i32
    %c0_i32_0 = arith.constant 0 : i32
    return %c0_i32, %arg0 : i32, i32
  }
}

</mosaic_0001>

<bundles_post_ra>
// kernel: tpu_custom_call.1
= control target key start
LH: loop header
LB: loop body
LE: loop exit
PB: predicated region body
PF: predicated region fallthrough
CT: control target
= control target key end

     0   :  { %s4608_s0 = inlined_call_operand.vmem [shape: f32[18,1024], index: 0, kind: input, shape index: {}]   ;;  %s4609_s1 = inlined_call_operand.vmem [shape: bf16[256,96], index: 1, kind: input, shape index: {}]   ;;  %s4610_s2 = inlined_call_operand.vmem [shape: bf16[128,256], index: 2, kind: input, shape index: {}]   ;;  %s4611_s3 = inlined_call_operand.vmem [shape: f32[128,1], index: 3, kind: input, shape index: {}]   ;;  %s4612_s4 = inlined_call_operand.vmem [shape: bf16[64,128], index: 4, kind: input, shape index: {}]   ;;  %s4613_s5 = inlined_call_operand.vmem [shape: f32[64,1], index: 5, kind: input, shape index: {}]   ;;  %s4614_s6 = inlined_call_operand.vmem [shape: f32[16,1], index: 6, kind: input, shape index: {}]   ;;  %s4615_s7 = inlined_call_operand.vmem [shape: f32[64,1], index: 7, kind: input, shape index: {}]   ;;  %s4616_s8 = inlined_call_operand.<no memory space> [shape: f32[1,1], index: 8, kind: input, shape index: {}]   ;;  %s4617_s9 = inlined_call_operand.hbm [shape: f32[1,1024], index: 9, kind: output, shape index: {}]  }
   0x1   :  { %v14_v0 = vstv %s4616_s8 }
   0x2   :  { %15 = vst [vmem:[#allocation3] sm:$0x1] %v14_v0 }
   0x3   :  { %16 = vsyncpa [#allocation6], 0 }
   0x4   :  { %18 = vsyncpa [#allocation6 + $0x1], 0  ;;  %s3261_s11 = smov 0   ;;  %s3263_s12 = smov 0  }
   0x5   :  { %s3265_s13 = smov 0   ;;  %s3267_s14 = smov 0  }
   0x6 LB: > { %s2641_s8 = sadd.s32 4294967295, %s3203_s14   ;;  %s2642_s15 = sadd.s32 4294967294, %s3203_s14   ;;  %s3203_s14 = sphi %s3267_s14, %s4655_s14   ;;  %s3199_s13 = sphi %s3265_s13, %s4654_s13   ;;  %s3195_s12 = sphi %s3263_s12, %s4653_s12   ;;  %s3191_s11 = sphi %s3261_s11, %s4652_s11  }
   0x7   : > { %s3284_s16 = sadd.s32 1, %s3203_s14   ;;  %s31_s17 = sadd.s32 1, %s3199_s13 }
   0x8   : > { %s28_s18 = ssub.s32 %s3203_s14, %s3284_s16  ;;  %p38_p0 = scmp.ne.s32.totalorder %s3199_s13, %s3195_s12 }
   0x9   : > { %p29_p1 = scmp.eq.s32.totalorder %s28_s18, 0  ;;  %p39_p2 = scmp.eq.s32.totalorder %s3203_s14, 0 }
   0xa   : > { %p236_p3 = scmp.eq.s32.totalorder %s2641_s8, 1  ;;  %p241_p4 = scmp.ne.s32.totalorder %s3195_s12, %s3191_s11 }
   0xb   : > { %s3297_s19 = scalar_select %p29_p1, %s3199_s13, %s31_s17  }
   0xc   : > { %p40_p5 = por %p39_p2, %p38_p0  ;;  %p3299_p6 = por %p236_p3, %p38_p0 }
   0xd   : > { %p242_p7 = scmp.eq.s32.totalorder %s2642_s15, 1  ;;  %p2644_p9 = scmp.ge.s32.totalorder %s3203_s14, 2 }
   0xf   : > { %p3303_p8 = por %p242_p7, %p241_p4  ;;  %282 = sbr.rel (%p2644_p9) target bundleno = 36 (0x24), region = 48 }
  0x14   : > { %285 = sbr.rel (!%p40_p5) target bundleno = 36 (0x24), region = 52  ;;  %s287_s22 = sand.u32 (%p40_p5), 1, %s3199_s13  }
  0x15   : > { %s2989_s23 = sshll.u32 (%p40_p5), %s3203_s14, 5  ;;  %s3050_s24 = smul.u32 (%p40_p5), 96, %s287_s22 }
  0x16   : > { %s292_s27 = scalar_lea.vmem (%p40_p5), %s4608_s0, %s2989_s23 }
  0x17   : > { %v305_v1 = vld [vmem:[%s292_s27] sm:$0xff] (%p40_p5)  ;;  %v307_v2 = vld [vmem:[%s292_s27 + $0x8] sm:$0xff] (%p40_p5)  ;;  %v309_v3 = vld [vmem:[%s292_s27 + $0x10] sm:$0xff] (%p40_p5)  ;;  %s289_s28 = scalar_lea.vmem (%p40_p5), [#allocation4], %s3050_s24 }
  0x18   : > { %306 = vst [vmem:[%s289_s28] sm:$0xff] (%p40_p5), %v305_v1  ;;  %v311_v4 = vld [vmem:[%s292_s27 + $0x18] sm:$0xff] (%p40_p5)  ;;  %v313_v5 = vld [vmem:[%s292_s27 + $0x40] sm:$0xff] (%p40_p5)  ;;  %v315_v6 = vld [vmem:[%s292_s27 + $0x48] sm:$0xff] (%p40_p5) }
  0x19   : > { %308 = vst [vmem:[%s289_s28 + $0x8] sm:$0xff] %v307_v2  ;;  %v317_v7 = vld [vmem:[%s292_s27 + $0x50] sm:$0xff]  ;;  %v319_v8 = vld [vmem:[%s292_s27 + $0x58] sm:$0xff]  ;;  %v321_v9 = vld [vmem:[%s292_s27 + $0x80] sm:$0xff] }
  0x1a   : > { %310 = vst [vmem:[%s289_s28 + $0x10] sm:$0xff] %v309_v3  ;;  %v323_v10 = vld [vmem:[%s292_s27 + $0x88] sm:$0xff]  ;;  %v325_v11 = vld [vmem:[%s292_s27 + $0x90] sm:$0xff]  ;;  %v327_v12 = vld [vmem:[%s292_s27 + $0x98] sm:$0xff] }
  0x1b   : > { %312 = vst [vmem:[%s289_s28 + $0x18] sm:$0xff] %v311_v4 }
  0x1c   : > { %314 = vst [vmem:[%s289_s28 + $0x20] sm:$0xff] %v313_v5 }
  0x1d   : > { %316 = vst [vmem:[%s289_s28 + $0x28] sm:$0xff] %v315_v6 }
  0x1e   : > { %318 = vst [vmem:[%s289_s28 + $0x30] sm:$0xff] %v317_v7 }
  0x1f   : > { %320 = vst [vmem:[%s289_s28 + $0x38] sm:$0xff] %v319_v8 }
  0x20   : > { %322 = vst [vmem:[%s289_s28 + $0x40] sm:$0xff] %v321_v9 }
  0x21   : > { %324 = vst [vmem:[%s289_s28 + $0x48] sm:$0xff] %v323_v10 }
  0x22   : > { %326 = vst [vmem:[%s289_s28 + $0x50] sm:$0xff] %v325_v11 }
  0x23   : > { %328 = vst [vmem:[%s289_s28 + $0x58] sm:$0xff] %v327_v12 }
  0x24 PF: > { %p2647_p10 = scmp.ge.s32.totalorder %s3203_s14, 1  ;;  %p333_p11 = scmp.lt.s32.totalorder %s3203_s14, 3 }
  0x26   : > { %p334_p12 = pnand %p2647_p10, %p333_p11 }
  0x28   : > { %337 = sbr.rel (%p334_p12) target bundleno = 1160 (0x488), region = 75 }
  0x2d   : > { %s3318_s29 = sand.u32 1, %s3195_s12   ;;  %v4618_v13 = vlaneseq  ;;  %v3205_v14 = vmov 1065369472   ;;  %v3206_v61 = vmov 0.0   ;;  %s2986_s26 = sshll.u32 %s2641_s8, 2 }
  0x2e   : > { %546 = vst [vmem:[#allocation2 + $0xa0] sm:$0xff] %v3205_v14  ;;  %s3051_s30 = smul.u32 96, %s3318_s29  ;;  %s2562_s18 = scalar_lea.sflag [#allocation6], %s3318_s29 }
  0x2f   : > { %548 = vst [vmem:[#allocation2 + $0xb0] sm:$0xff] %v3205_v14  ;;  %v3322_v15 = vshrl.u32 %v4618_v13, 7 }
  0x30   : > { %547 = vst [vmem:[#allocation2 + $0xa8] sm:$0xff] %v3205_v14  ;;  %s3324_s10 = scalar_lea.vmem [#allocation4], %s3051_s30  ;;  %s2572_s30 = scalar_lea.hbm %s4617_s9, %s2986_s26 }
  0x31   : > { %549 = vst [vmem:[#allocation2 + $0xb8] sm:$0xff] %v3205_v14  ;;  %v379_v16 = vld [vmem:[%s3324_s10] sm:$0xff]  ;;  %v380_v17 = vld [vmem:[%s3324_s10 + $0x8] sm:$0xff]  ;;  %v381_v26 = vld [vmem:[%s3324_s10 + $0x10] sm:$0xff]  ;;  %v3336_v31 = vadd.s32 32, %v3322_v15  ;;  %v3344_v37 = vadd.s32 40, %v3322_v15 }
  0x32   : > { %v383_v18 = vld [vmem:[%s3324_s10 + $0x20] sm:$0xff]  ;;  %v384_v19 = vld [vmem:[%s3324_s10 + $0x28] sm:$0xff]  ;;  %v538_v20 = vpack.c.bf16 %v380_v17, %v379_v16  ;;  %v382_v27 = vld [vmem:[%s3324_s10 + $0x18] sm:$0xff]  ;;  %v3348_v44 = vadd.s32 16, %v3322_v15  ;;  %v3351_v45 = vadd.s32 24, %v3322_v15  ;;  %v3354_v51 = vadd.s32 8, %v3322_v15 }
  0x33   : > { %v387_v21 = vld [vmem:[%s3324_s10 + $0x40] sm:$0x3]  ;;  %v388_v22 = vld [vmem:[%s3324_s10 + $0x48] sm:$0x3]  ;;  %v540_v23 = vpack.c.bf16 %v384_v19, %v383_v18  ;;  %v385_v28 = vld [vmem:[%s3324_s10 + $0x30] sm:$0xff]  ;;  %v539_v38 = vpack.c.bf16 %v382_v27, %v381_v26  ;;  %s2576_s17 = sshll.u32 %s2572_s30, 4  ;;  %s2577_s17 = int_to_ptr.hbm [resolvable:$true] %s2576_s17 }
  0x34   : > { %vm3052_vm0 = vcmp.lt.s32.totalorder %v387_v21, 0  ;;  %v3053_v24 = vceil.f32 %v387_v21  ;;  %v3054_v25 = vfloor.f32 %v387_v21  ;;  %542 = vst [vmem:[#allocation2 + $0x80] sm:$0xff] %v538_v20  ;;  %vm3057_vm1 = vcmp.lt.s32.totalorder %v388_v22, 0  ;;  %v386_v32 = vld [vmem:[%s3324_s10 + $0x38] sm:$0xff]  ;;  %v3340_v33 = vld [vmem:[%s3324_s10 + $0x50] sm:$0x3] }
  0x35   : > { %v3058_v29 = vceil.f32 %v388_v22  ;;  %v3059_v30 = vfloor.f32 %v388_v22  ;;  %v2827_v34 = vld [vmem:[#allocation2 + $0xa0] sm:$0xf]  ;;  %v3026_v35 = vld [vmem:[#allocation2 + $0xa4] sm:$0xf]  ;;  %544 = vst [vmem:[#allocation2 + $0x90] sm:$0xff] %v540_v23  ;;  %v541_v39 = vpack.c.bf16 %v386_v32, %v385_v28  ;;  %v3063_v54 = vceil.f32 %v3340_v33  ;;  %s3155_s22 = sshra.s32 %s2577_s17, 4  ;;  %s3156_s22 = int_to_ptr.hbm [resolvable:$true] %s3155_s22 }
  0x36   : > { %v3055_v36 = vsel %vm3052_vm0, %v3053_v24, %v3054_v25  ;;  %v3028_v40 = vld [vmem:[#allocation2 + $0xac] sm:$0xf0]  ;;  %v2829_v41 = vld [vmem:[#allocation2 + $0xb0] sm:$0xf0]  ;;  %543 = vst [vmem:[#allocation2 + $0x88] sm:$0xff] %v539_v38  ;;  %v3064_v58 = vfloor.f32 %v3340_v33  ;;  %vm3062_vm6 = vcmp.lt.s32.totalorder %v3340_v33, 0  ;;  %p3162_p2 = scmp.lt.s32.totalorder %s3156_s22, %s4617_s9 }
  0x37   : > { %v3056_v42 = vcvt.f32.s32 %v3055_v36  ;;  %v3060_v43 = vsel %vm3057_vm1, %v3058_v29, %v3059_v30  ;;  %v2828_v46 = vor.u32 %v3028_v40, %v2827_v34  ;;  %v2832_v47 = vor.u32 %v3026_v35, %v2829_v41  ;;  %v3027_v49 = vld [vmem:[#allocation2 + $0xac] sm:$0xf]  ;;  %545 = vst [vmem:[#allocation2 + $0x98] sm:$0xff] %v541_v39  ;;  %v2835_v16 = vld [vmem:[#allocation2 + $0xa8] sm:$0xf]  ;;  %s3157_s23 = scalar_lea.hbm %s3156_s22, 4 }
  0x38   : > { %v3061_v48 = vcvt.f32.s32 %v3060_v43  ;;  %v2837_v53 = vld [vmem:[#allocation2 + $0xb8] sm:$0xf0]  ;;  %v3029_v19 = vld [vmem:[#allocation2 + $0xb4] sm:$0xf0]  ;;  %v3065_v40 = vsel %vm3062_vm6, %v3063_v54, %v3064_v58  ;;  %p3158_p13 = scmp.ne.s32.totalorder %s3156_s22, %s3157_s23 }
  0x39   : > { %v438_v50 = vperm.slane %v3056_v42, 1  ;;  %v3356_v52 = vperm.slane %v3056_v42, 0  ;;  %857 = vmatpush.bf16.msra.mxu0 %v2828_v46  ;;  %946 = vmatpush.bf16.msra.mxu1 %v2832_v47  ;;  %v2840_v57 = vor.u32 %v3027_v49, %v2837_v53  ;;  %v390_v26 = vld [vmem:[%s3324_s10 + $0x58] sm:$0x3]  ;;  %v2836_v35 = vor.u32 %v3029_v19, %v2835_v16 }
  0x3a   : > { %v439_v55 = vperm.slane %v3061_v48, 1  ;;  %v403_v56 = vperm.slane %v3061_v48, 0  ;;  %v3068_v41 = vceil.f32 %v390_v26  ;;  %v3066_v46 = vcvt.f32.s32 %v3065_v40  ;;  %p3159_p0 = pnand %p3158_p13, %p3299_p6 }
  0x3b   : > { %vm458_vm2 = vcmp.eq.s32.totalorder %v3336_v31, %v438_v50  ;;  %vm462_vm3 = vcmp.eq.s32.totalorder %v3344_v37, %v438_v50  ;;  %vm450_vm4 = vcmp.eq.s32.totalorder %v3348_v44, %v438_v50  ;;  %vm454_vm5 = vcmp.eq.s32.totalorder %v3351_v45, %v438_v50  ;;  %v2811_v59 = vld [vmem:[#allocation2 + $0x80] sm:$0xf]  ;;  %v3022_v60 = vld [vmem:[#allocation2 + $0x84] sm:$0xf]  ;;  %1124 = vmatpush.bf16.msra.mxu3 %v2840_v57 }
  0x3c   : > { %vm459_vm7 = vcmp.eq.s32.totalorder %v3336_v31, %v439_v55  ;;  %vm463_vm8 = vcmp.eq.s32.totalorder %v3344_v37, %v439_v55  ;;  %v2673_v62 = vsel %vm458_vm2, 1.0, %v3206_v61  ;;  %v2677_v63 = vsel %vm462_vm3, 1.0, %v3206_v61  ;;  %v3024_v0 = vld [vmem:[#allocation2 + $0x8c] sm:$0xf0]  ;;  %v2813_v1 = vld [vmem:[#allocation2 + $0x90] sm:$0xf0]  ;;  %1035 = vmatpush.bf16.msra.mxu2 %v2836_v35  ;;  %p3160_p1 = pneg %p3159_p0 }
  0x3d   : > { %v2674_v2 = vsel %vm459_vm7, 1.0, %v3206_v61  ;;  %v2678_v3 = vsel %vm463_vm8, 1.0, %v3206_v61  ;;  %vm451_vm9 = vcmp.eq.s32.totalorder %v3348_v44, %v439_v55  ;;  %vm455_vm10 = vcmp.eq.s32.totalorder %v3351_v45, %v439_v55  ;;  %v3023_v18 = vld [vmem:[#allocation2 + $0x8c] sm:$0xf]  ;;  %v2819_v36 = vld [vmem:[#allocation2 + $0x88] sm:$0xf] }
  0x3e   : > { %v2812_v4 = vor.u32 %v3024_v0, %v2811_v59  ;;  %v2816_v5 = vor.u32 %v3022_v60, %v2813_v1  ;;  %v522_v6 = vpack.c.bf16 %v2674_v2, %v2673_v62  ;;  %v524_v7 = vpack.c.bf16 %v2678_v3, %v2677_v63  ;;  %v2821_v23 = vld [vmem:[#allocation2 + $0x98] sm:$0xf0]  ;;  %v3025_v38 = vld [vmem:[#allocation2 + $0x94] sm:$0xf0] }
  0x3f   : > { %v2665_v8 = vsel %vm450_vm4, 1.0, %v3206_v61  ;;  %v2666_v9 = vsel %vm451_vm9, 1.0, %v3206_v61  ;;  %v2669_v10 = vsel %vm454_vm5, 1.0, %v3206_v61  ;;  %v2670_v11 = vsel %vm455_vm10, 1.0, %v3206_v61 }
  0x40   : > { %858 = vmatpush.bf16.msra.mxu0 %v2812_v4  ;;  %947 = vmatpush.bf16.msra.mxu1 %v2816_v5  ;;  %534 = vst [vmem:[#allocation2 + $0x60] sm:$0xff] %v522_v6  ;;  %v518_v12 = vpack.c.bf16 %v2666_v9, %v2665_v8  ;;  %v520_v14 = vpack.c.bf16 %v2670_v11, %v2669_v10  ;;  %vm3067_vm3 = vcmp.lt.s32.totalorder %v390_v26, 0  ;;  %v3069_v47 = vfloor.f32 %v390_v26 }
  0x41   : > { %vm442_vm11 = vcmp.eq.s32.totalorder %v3322_v15, %v438_v50  ;;  %536 = vst [vmem:[#allocation2 + $0x70] sm:$0xff] %v524_v7  ;;  %vm443_vm12 = vcmp.eq.s32.totalorder %v3322_v15, %v439_v55  ;;  %vm446_vm13 = vcmp.eq.s32.totalorder %v3354_v51, %v438_v50  ;;  %vm447_vm14 = vcmp.eq.s32.totalorder %v3354_v51, %v439_v55 }
  0x42   : > { %v2657_v17 = vsel %vm442_vm11, 1.0, %v3206_v61  ;;  %530 = vst [vmem:[#allocation2 + $0x40] sm:$0xff] %v518_v12  ;;  %v2658_v20 = vsel %vm443_vm12, 1.0, %v3206_v61  ;;  %v2661_v21 = vsel %vm446_vm13, 1.0, %v3206_v61  ;;  %v2662_v22 = vsel %vm447_vm14, 1.0, %v3206_v61 }
  0x43   : > { %vm406_vm15 = vcmp.eq.s32.totalorder %v3322_v15, %v3356_v52  ;;  %532 = vst [vmem:[#allocation2 + $0x50] sm:$0xff] %v520_v14  ;;  %v514_v24 = vpack.c.bf16 %v2658_v20, %v2657_v17  ;;  %v516_v25 = vpack.c.bf16 %v2662_v22, %v2661_v21  ;;  %vm407_vm0 = vcmp.eq.s32.totalorder %v3322_v15, %v403_v56 }
  0x44   : > { %vm410_vm1 = vcmp.eq.s32.totalorder %v3354_v51, %v3356_v52  ;;  %vm411_vm2 = vcmp.eq.s32.totalorder %v3354_v51, %v403_v56  ;;  %v2649_v27 = vsel %vm406_vm15, 1.0, %v3206_v61  ;;  %v2650_v28 = vsel %vm407_vm0, 1.0, %v3206_v61 }
  0x45   : > { %v2653_v29 = vsel %vm410_vm1, 1.0, %v3206_v61  ;;  %526 = vst [vmem:[#allocation2 + $0x20] sm:$0xff] %v514_v24  ;;  %v2654_v30 = vsel %vm411_vm2, 1.0, %v3206_v61  ;;  %v430_v32 = vpack.c.bf16 %v2650_v28, %v2649_v27  ;;  %v2824_v34 = vor.u32 %v3023_v18, %v2821_v23 }
  0x46   : > { %528 = vst [vmem:[#allocation2 + $0x30] sm:$0xff] %v516_v25  ;;  %v432_v39 = vpack.c.bf16 %v2654_v30, %v2653_v29  ;;  %v2820_v50 = vor.u32 %v3025_v38, %v2819_v36  ;;  %v3070_v33 = vsel %vm3067_vm3, %v3068_v41, %v3069_v47  ;;  %v440_v54 = vperm.slane %v3066_v46, 1 }
  0x47   : > { %v2795_v42 = vld [vmem:[#allocation2 + $0x60] sm:$0xf]  ;;  %v3018_v43 = vld [vmem:[#allocation2 + $0x64] sm:$0xf]  ;;  %434 = vst [vmem:[#allocation2] sm:$0xff] %v430_v32  ;;  %1125 = vmatpush.bf16.msra.mxu3 %v2824_v34  ;;  %v3071_v59 = vcvt.f32.s32 %v3070_v33  ;;  %v404_v63 = vperm.slane %v3066_v46, 0 }
  0x48   : > { %v3020_v48 = vld [vmem:[#allocation2 + $0x6c] sm:$0xf0]  ;;  %v2797_v49 = vld [vmem:[#allocation2 + $0x70] sm:$0xf0]  ;;  %436 = vst [vmem:[#allocation2 + $0x10] sm:$0xff] %v432_v39  ;;  %vm460_vm4 = vcmp.eq.s32.totalorder %v3336_v31, %v440_v54  ;;  %vm464_vm5 = vcmp.eq.s32.totalorder %v3344_v37, %v440_v54  ;;  %1036 = vmatpush.bf16.msra.mxu2 %v2820_v50  ;;  %vm452_vm6 = vcmp.eq.s32.totalorder %v3348_v44, %v440_v54  ;;  %v2990_v32 = vld [vmem:[%s4609_s1] sm:$0xff] }
  0x49   : > { %v2796_v52 = vor.u32 %v3020_v48, %v2795_v42  ;;  %v2800_v53 = vor.u32 %v3018_v43, %v2797_v49  ;;  %v2779_v55 = vld [vmem:[#allocation2 + $0x40] sm:$0xf]  ;;  %v3014_v56 = vld [vmem:[#allocation2 + $0x44] sm:$0xf]  ;;  %v441_v2 = vperm.slane %v3071_v59, 1  ;;  %v2675_v3 = vsel %vm460_vm4, 1.0, %v3206_v61 }
  0x4a   : > { %v3016_v57 = vld [vmem:[#allocation2 + $0x4c] sm:$0xf0]  ;;  %v2781_v58 = vld [vmem:[#allocation2 + $0x50] sm:$0xf0]  ;;  %v2679_v6 = vsel %vm464_vm5, 1.0, %v3206_v61  ;;  %vm456_vm7 = vcmp.eq.s32.totalorder %v3351_v45, %v440_v54  ;;  %v2667_v7 = vsel %vm452_vm6, 1.0, %v3206_v61  ;;  %vm444_vm8 = vcmp.eq.s32.totalorder %v3322_v15, %v440_v54 }
  0x4b   : > { %859 = vmatpush.bf16.msra.mxu0 %v2796_v52  ;;  %948 = vmatpush.bf16.msra.mxu1 %v2800_v53  ;;  %v2780_v60 = vor.u32 %v3016_v57, %v2779_v55  ;;  %v2784_v62 = vor.u32 %v3014_v56, %v2781_v58  ;;  %vm461_vm9 = vcmp.eq.s32.totalorder %v3336_v31, %v441_v2  ;;  %v405_v29 = vperm.slane %v3071_v59, 0 }
  0x4c   : > { %v2763_v0 = vld [vmem:[#allocation2 + $0x20] sm:$0xf]  ;;  %v3010_v1 = vld [vmem:[#allocation2 + $0x24] sm:$0xf]  ;;  %vm465_vm10 = vcmp.eq.s32.totalorder %v3344_v37, %v441_v2  ;;  %v2676_v16 = vsel %vm461_vm9, 1.0, %v3206_v61  ;;  %vm453_vm11 = vcmp.eq.s32.totalorder %v3348_v44, %v441_v2  ;;  %vm457_vm12 = vcmp.eq.s32.totalorder %v3351_v45, %v441_v2 }
  0x4d   : > { %v3012_v4 = vld [vmem:[#allocation2 + $0x2c] sm:$0xf0]  ;;  %v2765_v5 = vld [vmem:[#allocation2 + $0x30] sm:$0xf0]  ;;  %v2680_v17 = vsel %vm465_vm10, 1.0, %v3206_v61  ;;  %v523_v20 = vpack.c.bf16 %v2676_v16, %v2675_v3  ;;  %v2668_v31 = vsel %vm453_vm11, 1.0, %v3206_v61  ;;  %vm445_vm13 = vcmp.eq.s32.totalorder %v3322_v15, %v441_v2 }
  0x4e   : > { %v2764_v8 = vor.u32 %v3012_v4, %v2763_v0  ;;  %v2768_v9 = vor.u32 %v3010_v1, %v2765_v5  ;;  %v2747_v10 = vld [vmem:[#allocation2] sm:$0xf]  ;;  %v3006_v11 = vld [vmem:[#allocation2 + $0x4] sm:$0xf]  ;;  %v525_v21 = vpack.c.bf16 %v2680_v17, %v2679_v6  ;;  %v2671_v37 = vsel %vm456_vm7, 1.0, %v3206_v61  ;;  %v2991_v0 = vld [vmem:[%s4609_s1 + $0x8] sm:$0xff] }
  0x4f   : > { %860 = vmatpush.bf16.msra.mxu0 %v2780_v60  ;;  %949 = vmatpush.bf16.msra.mxu1 %v2784_v62  ;;  %v3008_v12 = vld [vmem:[#allocation2 + $0xc] sm:$0xf0]  ;;  %v2749_v14 = vld [vmem:[#allocation2 + $0x10] sm:$0xf0]  ;;  %v2672_v22 = vsel %vm457_vm12, 1.0, %v3206_v61  ;;  %535 = vst [vmem:[#allocation2 + $0x68] sm:$0xff] %v523_v20  ;;  %v519_v23 = vpack.c.bf16 %v2668_v31, %v2667_v7  ;;  %vm448_vm14 = vcmp.eq.s32.totalorder %v3354_v51, %v440_v54 }
  0x50   : > { %v2748_v18 = vor.u32 %v3008_v12, %v2747_v10  ;;  %v2752_v19 = vor.u32 %v3006_v11, %v2749_v14  ;;  %v521_v24 = vpack.c.bf16 %v2672_v22, %v2671_v37  ;;  %vm449_vm15 = vcmp.eq.s32.totalorder %v3354_v51, %v441_v2  ;;  %537 = vst [vmem:[#allocation2 + $0x78] sm:$0xff] %v525_v21  ;;  %v2992_v1 = vld [vmem:[%s4609_s1 + $0x10] sm:$0xff]  ;;  %v2993_v2 = vld [vmem:[%s4609_s1 + $0x18] sm:$0xff]  ;;  %v2994_v3 = vld [vmem:[%s4609_s1 + $0x20] sm:$0xff] }
  0x51   : > { %v2659_v44 = vsel %vm444_vm8, 1.0, %v3206_v61  ;;  %v2660_v45 = vsel %vm445_vm13, 1.0, %v3206_v61  ;;  %v2663_v25 = vsel %vm448_vm14, 1.0, %v3206_v61  ;;  %v2664_v26 = vsel %vm449_vm15, 1.0, %v3206_v61  ;;  %531 = vst [vmem:[#allocation2 + $0x48] sm:$0xff] %v519_v23  ;;  %v2995_v4 = vld [vmem:[%s4609_s1 + $0x28] sm:$0xff] }
  0x52   : > { %v515_v27 = vpack.c.bf16 %v2660_v45, %v2659_v44  ;;  %v517_v28 = vpack.c.bf16 %v2664_v26, %v2663_v25  ;;  %vm408_vm0 = vcmp.eq.s32.totalorder %v3322_v15, %v404_v63  ;;  %533 = vst [vmem:[#allocation2 + $0x58] sm:$0xff] %v521_v24  ;;  %vm412_vm1 = vcmp.eq.s32.totalorder %v3354_v51, %v404_v63  ;;  %v2996_v5 = vld [vmem:[%s4609_s1 + $0x30] sm:$0xff]  ;;  %v2997_v6 = vld [vmem:[%s4609_s1 + $0x38] sm:$0xff]  ;;  %v2998_v7 = vld [vmem:[%s4609_s1 + $0x40] sm:$0xff] }
  0x53   : > { %861 = vmatpush.bf16.msra.mxu0 %v2764_v8  ;;  %950 = vmatpush.bf16.msra.mxu1 %v2768_v9  ;;  %v2651_v30 = vsel %vm408_vm0, 1.0, %v3206_v61  ;;  %vm409_vm2 = vcmp.eq.s32.totalorder %v3322_v15, %v405_v29  ;;  %vm413_vm3 = vcmp.eq.s32.totalorder %v3354_v51, %v405_v29  ;;  %v2655_v34 = vsel %vm412_vm1, 1.0, %v3206_v61  ;;  %v2999_v20 = vld [vmem:[%s4609_s1 + $0x48] sm:$0xff]  ;;  %v3000_v29 = vld [vmem:[%s4609_s1 + $0x50] sm:$0xff] }
  0x54   : > { %527 = vst [vmem:[#allocation2 + $0x28] sm:$0xff] %v515_v27  ;;  %vm806_vm4 = vcmask 785408   ;;  %v2652_v35 = vsel %vm409_vm2, 1.0, %v3206_v61  ;;  %v2656_v36 = vsel %vm413_vm3, 1.0, %v3206_v61  ;;  %vm2549_vm8 = vcmask 1040384  }
  0x55   : > { %529 = vst [vmem:[#allocation2 + $0x38] sm:$0xff] %v517_v28  ;;  %v431_v38 = vpack.c.bf16 %v2652_v35, %v2651_v30  ;;  %v433_v39 = vpack.c.bf16 %v2656_v36, %v2655_v34  ;;  %vm2551_vm9 = vcmask 1042434   ;;  %vm2553_vm11 = vcmask 1041408  }
  0x56   : > { %v3019_v40 = vld [vmem:[#allocation2 + $0x6c] sm:$0xf]  ;;  %v2803_v41 = vld [vmem:[#allocation2 + $0x68] sm:$0xf] }
  0x57   : > { %862 = vmatpush.bf16.msra.mxu0 %v2748_v18  ;;  %951 = vmatpush.bf16.msra.mxu1 %v2752_v19  ;;  %v2805_v15 = vld [vmem:[#allocation2 + $0x78] sm:$0xf0]  ;;  %v3021_v51 = vld [vmem:[#allocation2 + $0x74] sm:$0xf0]  ;;  %435 = vst [vmem:[#allocation2 + $0x8] sm:$0xff] %v431_v38 }
  0x58   : > { %v2808_v42 = vor.u32 %v3019_v40, %v2805_v15  ;;  %v3015_v43 = vld [vmem:[#allocation2 + $0x4c] sm:$0xf]  ;;  %v2804_v46 = vor.u32 %v3021_v51, %v2803_v41  ;;  %v2787_v47 = vld [vmem:[#allocation2 + $0x48] sm:$0xf]  ;;  %437 = vst [vmem:[#allocation2 + $0x18] sm:$0xff] %v433_v39 }
  0x59   : > { %v2789_v48 = vld [vmem:[#allocation2 + $0x58] sm:$0xf0]  ;;  %v3017_v49 = vld [vmem:[#allocation2 + $0x54] sm:$0xf0] }
  0x5a   : > { %2841 = vmatmul.msk.bf16.vlgmr.msra.gmra.mxu0 %vm806_vm4, %v2990_v32  ;;  %2857 = vmatmul.msk.bf16.vlgmr.msra.gmra.mxu1 %vm806_vm4, %v2990_v32  ;;  %v2792_v61 = vor.u32 %v3015_v43, %v2789_v48  ;;  %v2788_v52 = vor.u32 %v3017_v49, %v2787_v47  ;;  %v3001_v47 = vld [vmem:[%s4609_s1 + $0x58] sm:$0xff] }
  0x5b   : > { %1126 = vmatpush.bf16.msra.mxu3 %v2808_v42  ;;  %1037 = vmatpush.bf16.msra.mxu2 %v2804_v46  ;;  %v3011_v50 = vld [vmem:[#allocation2 + $0x2c] sm:$0xf]  ;;  %v2771_v55 = vld [vmem:[#allocation2 + $0x28] sm:$0xf] }
  0x5c   : > { %v2773_v53 = vld [vmem:[#allocation2 + $0x38] sm:$0xf0]  ;;  %v3013_v56 = vld [vmem:[#allocation2 + $0x34] sm:$0xf0] }
  0x5d   : > { %v2776_v33 = vor.u32 %v3011_v50, %v2773_v53  ;;  %v2772_v57 = vor.u32 %v3013_v56, %v2771_v55 }
  0x5e   : > { %v3007_v54 = vld [vmem:[#allocation2 + $0xc] sm:$0xf]  ;;  %v2755_v59 = vld [vmem:[#allocation2 + $0x8] sm:$0xf] }
  0x5f   : > { %1127 = vmatpush.bf16.msra.mxu3 %v2792_v61  ;;  %1038 = vmatpush.bf16.msra.mxu2 %v2788_v52  ;;  %v2757_v58 = vld [vmem:[#allocation2 + $0x18] sm:$0xf0]  ;;  %v3009_v60 = vld [vmem:[#allocation2 + $0x14] sm:$0xf0] }
  0x60   : > { %v2760_v62 = vor.u32 %v3007_v54, %v2757_v58  ;;  %v2756_v63 = vor.u32 %v3009_v60, %v2755_v59 }
  0x63   : > { %1128 = vmatpush.bf16.msra.mxu3 %v2776_v33  ;;  %1039 = vmatpush.bf16.msra.mxu2 %v2772_v57 }
  0x67   : > { %1129 = vmatpush.bf16.msra.mxu3 %v2760_v62  ;;  %1040 = vmatpush.bf16.msra.mxu2 %v2756_v63  ;;  %v3002_v62 = vld [vmem:[%s4609_s1 + $0x60] sm:$0xff] }
  0x6a   : > { %2842 = vmatmul.msk.bf16.gmra.mxu0 %vm806_vm4, %v2991_v0  ;;  %2858 = vmatmul.msk.bf16.gmra.mxu1 %vm806_vm4, %v2991_v0 }
  0x6b   : > { %2889 = vmatmul.msk.bf16.vlgmr.msra.gmra.mxu3 %vm806_vm4, %v2990_v32  ;;  %2873 = vmatmul.msk.bf16.vlgmr.msra.gmra.mxu2 %vm806_vm4, %v2990_v32 }
  0x7a   : > { %2843 = vmatmul.msk.bf16.gmra.mxu0 %vm806_vm4, %v2992_v1  ;;  %2859 = vmatmul.msk.bf16.gmra.mxu1 %vm806_vm4, %v2992_v1 }
  0x7b   : > { %2890 = vmatmul.msk.bf16.gmra.mxu3 %vm806_vm4, %v2991_v0  ;;  %2874 = vmatmul.msk.bf16.gmra.mxu2 %vm806_vm4, %v2991_v0 }
  0x8a   : > { %2844 = vmatmul.msk.bf16.gmra.mxu0 %vm806_vm4, %v2993_v2  ;;  %2860 = vmatmul.msk.bf16.gmra.mxu1 %vm806_vm4, %v2993_v2 }
  0x8b   : > { %2891 = vmatmul.msk.bf16.gmra.mxu3 %vm806_vm4, %v2992_v1  ;;  %2875 = vmatmul.msk.bf16.gmra.mxu2 %vm806_vm4, %v2992_v1 }
  0x9a   : > { %2845 = vmatmul.msk.bf16.gmra.mxu0 %vm806_vm4, %v2994_v3  ;;  %2861 = vmatmul.msk.bf16.gmra.mxu1 %vm806_vm4, %v2994_v3 }
  0x9b   : > { %2892 = vmatmul.msk.bf16.gmra.mxu3 %vm806_vm4, %v2993_v2  ;;  %2876 = vmatmul.msk.bf16.gmra.mxu2 %vm806_vm4, %v2993_v2 }
  0xaa   : > { %2846 = vmatmul.msk.bf16.gmra.mxu0 %vm806_vm4, %v2995_v4  ;;  %2862 = vmatmul.msk.bf16.gmra.mxu1 %vm806_vm4, %v2995_v4 }
  0xab   : > { %2893 = vmatmul.msk.bf16.gmra.mxu3 %vm806_vm4, %v2994_v3  ;;  %2877 = vmatmul.msk.bf16.gmra.mxu2 %vm806_vm4, %v2994_v3 }
  0xba   : > { %2847 = vmatmul.msk.bf16.gmra.mxu0 %vm806_vm4, %v2996_v5  ;;  %2863 = vmatmul.msk.bf16.gmra.mxu1 %vm806_vm4, %v2996_v5 }
  0xbb   : > { %2894 = vmatmul.msk.bf16.gmra.mxu3 %vm806_vm4, %v2995_v4  ;;  %2878 = vmatmul.msk.bf16.gmra.mxu2 %vm806_vm4, %v2995_v4 }
  0xca   : > { %2848 = vmatmul.msk.bf16.gmra.mxu0 %vm806_vm4, %v2997_v6  ;;  %2864 = vmatmul.msk.bf16.gmra.mxu1 %vm806_vm4, %v2997_v6 }
  0xcb   : > { %2895 = vmatmul.msk.bf16.gmra.mxu3 %vm806_vm4, %v2996_v5  ;;  %2879 = vmatmul.msk.bf16.gmra.mxu2 %vm806_vm4, %v2996_v5 }
  0xd7   : > { %v864_v8 = vpop.f32.mrf.mxu0  ;;  %v953_v9 = vpop.f32.mrf.mxu1 }
  0xd8   : > { %v1211_v12 = vmax.f32 %v864_v8, 0.0  ;;  %v1212_v14 = vmax.f32 %v953_v9, 0.0 }
  0xda   : > { %2849 = vmatmul.msk.bf16.gmra.mxu0 %vm806_vm4, %v2998_v7  ;;  %2865 = vmatmul.msk.bf16.gmra.mxu1 %vm806_vm4, %v2998_v7 }
  0xdb   : > { %2896 = vmatmul.msk.bf16.gmra.mxu3 %vm806_vm4, %v2997_v6  ;;  %2880 = vmatmul.msk.bf16.gmra.mxu2 %vm806_vm4, %v2997_v6 }
  0xdf   : > { %v866_v10 = vpop.f32.mrf.mxu0  ;;  %v955_v11 = vpop.f32.mrf.mxu1 }
  0xe0   : > { %v1215_v16 = vmax.f32 %v866_v10, 0.0  ;;  %v1216_v17 = vmax.f32 %v955_v11, 0.0 }
  0xe2   : > { %v3504_v18 = vpack.c.bf16 %v1215_v16, %v1211_v12  ;;  %v3506_v19 = vpack.c.bf16 %v1216_v17, %v1212_v14 }
  0xe7   : > { %v869_v21 = vpop.f32.mrf.mxu0  ;;  %v958_v31 = vpop.f32.mrf.mxu1 }
  0xe8   : > { %v1219_v23 = vmax.f32 %v869_v21, 0.0  ;;  %v1220_v24 = vmax.f32 %v958_v31, 0.0 }
  0xea   : > { %2850 = vmatmul.msk.bf16.gmra.mxu0 %vm806_vm4, %v2999_v20  ;;  %2866 = vmatmul.msk.bf16.gmra.mxu1 %vm806_vm4, %v2999_v20 }
  0xeb   : > { %2897 = vmatmul.msk.bf16.gmra.mxu3 %vm806_vm4, %v2998_v7  ;;  %2881 = vmatmul.msk.bf16.gmra.mxu2 %vm806_vm4, %v2998_v7  ;;  %v3003_v7 = vld [vmem:[%s4609_s1 + $0x68] sm:$0xff] }
  0xee   : > { %v3515_v25 = vpop.f32.mrf.mxu3  ;;  %v3517_v26 = vpop.f32.mrf.mxu2 }
  0xef   : > { %v871_v37 = vpop.f32.mrf.mxu0  ;;  %v960_v22 = vpop.f32.mrf.mxu1  ;;  %v1214_v10 = vmax.f32 %v3515_v25, 0.0  ;;  %v1213_v17 = vmax.f32 %v3517_v26, 0.0 }
  0xf0   : > { %v1223_v44 = vmax.f32 %v871_v37, 0.0  ;;  %v1224_v45 = vmax.f32 %v960_v22, 0.0 }
  0xf2   : > { %v3519_v27 = vpack.c.bf16 %v1223_v44, %v1219_v23  ;;  %v3521_v28 = vpack.c.bf16 %v1224_v45, %v1220_v24  ;;  %v3004_v24 = vld [vmem:[%s4609_s1 + $0x70] sm:$0xff] }
  0xf6   : > { %v1133_v34 = vpop.f32.mrf.mxu3  ;;  %v3526_v35 = vpop.f32.mrf.mxu2 }
  0xf7   : > { %v874_v30 = vpop.f32.mrf.mxu0  ;;  %v963_v32 = vpop.f32.mrf.mxu1  ;;  %v1218_v14 = vmax.f32 %v1133_v34, 0.0  ;;  %v1217_v31 = vmax.f32 %v3526_v35, 0.0 }
  0xf8   : > { %v1227_v39 = vmax.f32 %v874_v30, 0.0  ;;  %v1228_v40 = vmax.f32 %v963_v32, 0.0 }
  0xf9   : > { %v3592_v16 = vpack.c.bf16 %v1218_v14, %v1214_v10  ;;  %v3606_v23 = vpack.c.bf16 %v1217_v31, %v1213_v17 }
  0xfa   : > { %2851 = vmatmul.msk.bf16.gmra.mxu0 %vm806_vm4, %v3000_v29  ;;  %2867 = vmatmul.msk.bf16.gmra.mxu1 %vm806_vm4, %v3000_v29 }
  0xfb   : > { %2898 = vmatmul.msk.bf16.gmra.mxu3 %vm806_vm4, %v2999_v20  ;;  %2882 = vmatmul.msk.bf16.gmra.mxu2 %vm806_vm4, %v2999_v20 }
  0xfe   : > { %v3532_v51 = vpop.f32.mrf.mxu3  ;;  %v3534_v42 = vpop.f32.mrf.mxu2 }
  0xff   : > { %v876_v36 = vpop.f32.mrf.mxu0  ;;  %v965_v38 = vpop.f32.mrf.mxu1  ;;  %v1222_v44 = vmax.f32 %v3532_v51, 0.0  ;;  %v1221_v34 = vmax.f32 %v3534_v42, 0.0 }
 0x100   : > { %v1231_v41 = vmax.f32 %v876_v36, 0.0  ;;  %v1232_v15 = vmax.f32 %v965_v38, 0.0 }
 0x102   : > { %v3536_v43 = vpack.c.bf16 %v1231_v41, %v1227_v39  ;;  %v3538_v46 = vpack.c.bf16 %v1232_v15, %v1228_v40  ;;  %v3005_v15 = vld [vmem:[%s4609_s1 + $0x78] sm:$0xff] }
 0x106   : > { %v1138_v61 = vpop.f32.mrf.mxu3  ;;  %v3543_v50 = vpop.f32.mrf.mxu2 }
 0x107   : > { %v879_v48 = vpop.f32.mrf.mxu0  ;;  %v968_v49 = vpop.f32.mrf.mxu1  ;;  %v1226_v26 = vmax.f32 %v1138_v61, 0.0  ;;  %v1225_v38 = vmax.f32 %v3543_v50, 0.0 }
 0x108   : > { %v1235_v55 = vmax.f32 %v879_v48, 0.0  ;;  %v1236_v56 = vmax.f32 %v968_v49, 0.0 }
 0x109   : > { %v3618_v32 = vpack.c.bf16 %v1226_v26, %v1222_v44  ;;  %v3628_v41 = vpack.c.bf16 %v1225_v38, %v1221_v34 }
 0x10a   : > { %2852 = vmatmul.msk.bf16.gmra.mxu0 %vm806_vm4, %v3001_v47  ;;  %2868 = vmatmul.msk.bf16.gmra.mxu1 %vm806_vm4, %v3001_v47 }
 0x10b   : > { %2899 = vmatmul.msk.bf16.gmra.mxu3 %vm806_vm4, %v3000_v29  ;;  %2883 = vmatmul.msk.bf16.gmra.mxu2 %vm806_vm4, %v3000_v29 }
 0x10e   : > { %v3549_v57 = vpop.f32.mrf.mxu3  ;;  %v3551_v58 = vpop.f32.mrf.mxu2 }
 0x10f   : > { %v881_v52 = vpop.f32.mrf.mxu0  ;;  %v970_v53 = vpop.f32.mrf.mxu1  ;;  %v1230_v51 = vmax.f32 %v3549_v57, 0.0 }
 0x110   : > { %v1239_v33 = vmax.f32 %v881_v52, 0.0  ;;  %v1240_v54 = vmax.f32 %v970_v53, 0.0  ;;  %v1229_v52 = vmax.f32 %v3551_v58, 0.0 }
 0x112   : > { %v3553_v59 = vpack.c.bf16 %v1239_v33, %v1235_v55  ;;  %v3555_v60 = vpack.c.bf16 %v1240_v54, %v1236_v56 }
 0x116   : > { %v1143_v1 = vpop.f32.mrf.mxu3  ;;  %v3564_v2 = vpop.f32.mrf.mxu2 }
 0x117   : > { %v3560_v63 = vpop.f32.mrf.mxu0  ;;  %v3562_v0 = vpop.f32.mrf.mxu1  ;;  %v1234_v49 = vmax.f32 %v1143_v1, 0.0 }
 0x119   : > { %v3640_v50 = vpack.c.bf16 %v1234_v49, %v1230_v51 }
 0x11a   : > { %2853 = vmatmul.msk.bf16.gmra.mxu0 %vm806_vm4, %v3002_v62  ;;  %2869 = vmatmul.msk.bf16.gmra.mxu1 %vm806_vm4, %v3002_v62 }
 0x11b   : > { %2900 = vmatmul.msk.bf16.gmra.mxu3 %vm806_vm4, %v3001_v47  ;;  %2884 = vmatmul.msk.bf16.gmra.mxu2 %vm806_vm4, %v3001_v47 }
 0x11e   : > { %v3574_v5 = vpop.f32.mrf.mxu3  ;;  %v3576_v6 = vpop.f32.mrf.mxu2 }
 0x11f   : > { %v3570_v3 = vpop.f32.mrf.mxu0  ;;  %v3572_v4 = vpop.f32.mrf.mxu1  ;;  %v1238_v51 = vmax.f32 %v3574_v5, 0.0 }
 0x120   : > { %v1248_v49 = vmax.f32 %v3572_v4, 0.0 }
 0x126   : > { %v3586_v11 = vpop.f32.mrf.mxu3  ;;  %v3588_v12 = vpop.f32.mrf.mxu2 }
 0x127   : > { %v3581_v8 = vpop.f32.mrf.mxu0  ;;  %v3583_v9 = vpop.f32.mrf.mxu1 }
 0x12a   : > { %2854 = vmatmul.msk.bf16.gmra.mxu0 %vm806_vm4, %v3003_v7  ;;  %2870 = vmatmul.msk.bf16.gmra.mxu1 %vm806_vm4, %v3003_v7 }
 0x12b   : > { %2901 = vmatmul.msk.bf16.gmra.mxu3 %vm806_vm4, %v3002_v62  ;;  %2885 = vmatmul.msk.bf16.gmra.mxu2 %vm806_vm4, %v3002_v62  ;;  %v1233_v62 = vmax.f32 %v3564_v2, 0.0 }
 0x12d   : > { %v3650_v44 = vpack.c.bf16 %v1233_v62, %v1229_v52 }
 0x12e   : > { %v3602_v37 = vpop.f32.mrf.mxu3  ;;  %v3604_v22 = vpop.f32.mrf.mxu2 }
 0x12f   : > { %v3597_v20 = vpop.f32.mrf.mxu0  ;;  %v3599_v21 = vpop.f32.mrf.mxu1 }
 0x130   : > { %v1255_v26 = vmax.f32 %v3597_v20, 0.0  ;;  %v1256_v34 = vmax.f32 %v3599_v21, 0.0  ;;  %v1247_v21 = vmax.f32 %v3570_v3, 0.0 }
 0x136   : > { %v3612_v29 = vpop.f32.mrf.mxu3  ;;  %v3614_v30 = vpop.f32.mrf.mxu2 }
 0x137   : > { %v894_v45 = vpop.f32.mrf.mxu0  ;;  %v983_v25 = vpop.f32.mrf.mxu1 }
 0x138   : > { %v1260_v58 = vmax.f32 %v983_v25, 0.0 }
 0x13a   : > { %2855 = vmatmul.msk.bf16.gmra.mxu0 %vm806_vm4, %v3004_v24  ;;  %2871 = vmatmul.msk.bf16.gmra.mxu1 %vm806_vm4, %v3004_v24 }
 0x13b   : > { %2902 = vmatmul.msk.bf16.gmra.mxu3 %vm806_vm4, %v3003_v7  ;;  %2886 = vmatmul.msk.bf16.gmra.mxu2 %vm806_vm4, %v3003_v7 }
 0x13e   : > { %v3624_v39 = vpop.f32.mrf.mxu3  ;;  %v3626_v40 = vpop.f32.mrf.mxu2 }
 0x13f   : > { %v896_v35 = vpop.f32.mrf.mxu0  ;;  %v985_v36 = vpop.f32.mrf.mxu1 }
 0x140   : > { %v1263_v10 = vmax.f32 %v896_v35, 0.0  ;;  %v1264_v14 = vmax.f32 %v985_v36, 0.0  ;;  %v1251_v36 = vmax.f32 %v3581_v8, 0.0  ;;  %v1243_v8 = vmax.f32 %v3560_v63, 0.0 }
 0x142   : > { %v1380_v2 = vpack.c.bf16 %v1264_v14, %v1260_v58  ;;  %v1375_v52 = vpack.c.bf16 %v1255_v26, %v1251_v36  ;;  %v1371_v3 = vpack.c.bf16 %v1247_v21, %v1243_v8 }
 0x146   : > { %v3634_v42 = vpop.f32.mrf.mxu3  ;;  %v3636_v61 = vpop.f32.mrf.mxu2 }
 0x147   : > { %v899_v47 = vpop.f32.mrf.mxu0  ;;  %v988_v48 = vpop.f32.mrf.mxu1 }
 0x148   : > { %v1267_v53 = vmax.f32 %v899_v47, 0.0  ;;  %v1268_v33 = vmax.f32 %v988_v48, 0.0  ;;  %v1252_v48 = vmax.f32 %v3583_v9, 0.0  ;;  %v1244_v9 = vmax.f32 %v3562_v0, 0.0 }
 0x14a   : > { %2856 = vmatmul.msk.bf16.gmra.mxu0 %vm806_vm4, %v3005_v15  ;;  %2872 = vmatmul.msk.bf16.gmra.mxu1 %vm806_vm4, %v3005_v15  ;;  %v1376_v5 = vpack.c.bf16 %v1256_v34, %v1252_v48  ;;  %v1372_v4 = vpack.c.bf16 %v1248_v49, %v1244_v9 }
 0x14b   : > { %2903 = vmatmul.msk.bf16.gmra.mxu3 %vm806_vm4, %v3004_v24  ;;  %2887 = vmatmul.msk.bf16.gmra.mxu2 %vm806_vm4, %v3004_v24  ;;  %v1259_v24 = vmax.f32 %v894_v45, 0.0  ;;  %v1242_v45 = vmax.f32 %v3586_v11, 0.0  ;;  %v1241_v11 = vmax.f32 %v3588_v12, 0.0 }
 0x14d   : > { %v1379_v38 = vpack.c.bf16 %v1263_v10, %v1259_v24 }
 0x14e   : > { %v3646_v1 = vpop.f32.mrf.mxu3  ;;  %v3648_v7 = vpop.f32.mrf.mxu2 }
 0x14f   : > { %v901_v55 = vpop.f32.mrf.mxu0  ;;  %v990_v56 = vpop.f32.mrf.mxu1 }
 0x150   : > { %v1271_v54 = vmax.f32 %v901_v55, 0.0  ;;  %v1272_v57 = vmax.f32 %v990_v56, 0.0  ;;  %v1237_v55 = vmax.f32 %v3576_v6, 0.0 }
 0x152   : > { %v1383_v17 = vpack.c.bf16 %v1271_v54, %v1267_v53  ;;  %v1384_v31 = vpack.c.bf16 %v1272_v57, %v1268_v33  ;;  %v3664_v53 = vpack.c.bf16 %v1242_v45, %v1238_v51  ;;  %v1369_v54 = vpack.c.bf16 %v1241_v11, %v1237_v55 }
 0x154   : > { %1595 = vmatpush.bf16.msrb.mxu0 %v1383_v17  ;;  %1693 = vmatpush.bf16.msrb.mxu2 %v1384_v31 }
 0x156   : > { %v1163_v25 = vpop.f32.mrf.mxu3  ;;  %v1074_v20 = vpop.f32.mrf.mxu2 }
 0x157   : > { %v3655_v47 = vpop.f32.mrf.mxu0  ;;  %v3657_v35 = vpop.f32.mrf.mxu1  ;;  %v1266_v31 = vmax.f32 %v1163_v25, 0.0  ;;  %v1265_v24 = vmax.f32 %v1074_v20, 0.0 }
 0x158   : > { %1596 = vmatpush.bf16.msrb.mxu0 %v1379_v38  ;;  %1694 = vmatpush.bf16.msrb.mxu2 %v1380_v2 }
 0x15b   : > { %2904 = vmatmul.msk.bf16.gmra.mxu3 %vm806_vm4, %v3005_v15  ;;  %2888 = vmatmul.msk.bf16.gmra.mxu2 %vm806_vm4, %v3005_v15 }
 0x15c   : > { %1597 = vmatpush.bf16.msrb.mxu0 %v1375_v52  ;;  %1695 = vmatpush.bf16.msrb.mxu2 %v1376_v5 }
 0x15e   : > { %v1166_v63 = vpop.f32.mrf.mxu3  ;;  %v1077_v6 = vpop.f32.mrf.mxu2 }
 0x15f   : > { %v3672_v56 = vpop.f32.mrf.mxu0  ;;  %v3674_v33 = vpop.f32.mrf.mxu1  ;;  %v1270_v62 = vmax.f32 %v1166_v63, 0.0  ;;  %v1269_v10 = vmax.f32 %v1077_v6, 0.0 }
 0x160   : > { %1598 = vmatpush.bf16.msrb.mxu0 %v1371_v3  ;;  %1696 = vmatpush.bf16.msrb.mxu2 %v1372_v4 }
 0x164   : > { %1599 = vmatpush.bf16.msrb.mxu0 %v3553_v59  ;;  %1697 = vmatpush.bf16.msrb.mxu2 %v3555_v60  ;;  %v1262_v59 = vmax.f32 %v3646_v1, 0.0  ;;  %v1261_v60 = vmax.f32 %v3648_v7, 0.0  ;;  %v1258_v1 = vmax.f32 %v3634_v42, 0.0  ;;  %v1257_v7 = vmax.f32 %v3636_v61, 0.0 }
 0x165   : > { %v1249_v42 = vmax.f32 %v3614_v30, 0.0 }
 0x166   : > { %v1168_v15 = vpop.f32.mrf.mxu3  ;;  %v1079_v57 = vpop.f32.mrf.mxu2  ;;  %v1382_v2 = vpack.c.bf16 %v1266_v31, %v1262_v59  ;;  %v1381_v51 = vpack.c.bf16 %v1265_v24, %v1261_v60  ;;  %v3207_v24 = vmov 0  }
 0x167   : > { %v3678_v0 = vpop.f32.mrf.mxu0  ;;  %v3680_v12 = vpop.f32.mrf.mxu1  ;;  %v1274_v14 = vmax.f32 %v1168_v15, 0.0  ;;  %v1273_v17 = vmax.f32 %v1079_v57, 0.0  ;;  %3114 = vset.pattern.permute.xlu0 %v3207_v24  ;;  %3115 = vset.pattern.permute.xlu1 %v3207_v24 }
 0x168   : > { %1600 = vmatpush.bf16.msrb.mxu0 %v3536_v43  ;;  %1698 = vmatpush.bf16.msrb.mxu2 %v3538_v46 }
 0x169   : > { %v1386_v58 = vpack.c.bf16 %v1274_v14, %v1270_v62  ;;  %v1385_v43 = vpack.c.bf16 %v1273_v17, %v1269_v10  ;;  %3116 = vset.pattern.permute.xlu2 %v3207_v24 }
 0x16c   : > { %1601 = vmatpush.bf16.msrb.mxu0 %v3519_v27  ;;  %1699 = vmatpush.bf16.msrb.mxu2 %v3521_v28  ;;  %v1254_v27 = vmax.f32 %v3624_v39, 0.0  ;;  %v1253_v28 = vmax.f32 %v3626_v40, 0.0  ;;  %v1245_v39 = vmax.f32 %v3604_v22, 0.0  ;;  %v1250_v40 = vmax.f32 %v3612_v29, 0.0 }
 0x16e   : > { %v3698_v34 = vpop.f32.mrf.mxu3  ;;  %v3700_v38 = vpop.f32.mrf.mxu2  ;;  %v1378_v36 = vpack.c.bf16 %v1258_v1, %v1254_v27  ;;  %v1373_v21 = vpack.c.bf16 %v1249_v42, %v1245_v39  ;;  %v1427_v42 = vld [vmem:[%s4611_s3 + $0x40] sm:$0xff] }
 0x16f   : > { %v3688_v26 = vpop.f32.mrf.mxu0  ;;  %v3690_v46 = vpop.f32.mrf.mxu1  ;;  %4631 = vst [vmem:[#allocation8_spill] sm:$0xff] %v3698_v34  ;;  %v2915_v34 = vld [vmem:[%s4610_s2 + $0x10] sm:$0xf] }
 0x170   : > { %1602 = vmatpush.bf16.msrb.mxu0 %v3504_v18  ;;  %1700 = vmatpush.bf16.msrb.mxu2 %v3506_v19  ;;  %4632 = vst [vmem:[#allocation9_spill] sm:$0xff] %v3700_v38  ;;  %v1377_v18 = vpack.c.bf16 %v1257_v7, %v1253_v28  ;;  %v1246_v19 = vmax.f32 %v3602_v37, 0.0  ;;  %v2907_v7 = vld [vmem:[%s4610_s2] sm:$0xf] }
 0x172   : > { %v1374_v20 = vpack.c.bf16 %v1250_v40, %v1246_v19 }
 0x174   : > { %1889 = vmatpush.bf16.msra.mxu2 %v1386_v58  ;;  %1791 = vmatpush.bf16.msra.mxu0 %v1385_v43  ;;  %v1433_v58 = vld [vmem:[%s4611_s3 + $0x70] sm:$0xff] }
 0x175   : > { %1507 = vperm.xlu0 %3114, %v1433_v58  }
 0x176   : > { %v3710_v45 = vpop.f32.mrf.mxu3  ;;  %v3712_v25 = vpop.f32.mrf.mxu2 }
 0x177   : > { %v3706_v61 = vpop.f32.mrf.mxu0  ;;  %v3708_v48 = vpop.f32.mrf.mxu1  ;;  %4633 = vst [vmem:[#allocation10_spill] sm:$0xff] %v3710_v45 }
 0x178   : > { %1890 = vmatpush.bf16.msra.mxu2 %v1382_v2  ;;  %1792 = vmatpush.bf16.msra.mxu0 %v1381_v51  ;;  %4634 = vst [vmem:[#allocation11_spill] sm:$0xff] %v3712_v25  ;;  %v3031_v2 = vld [vmem:[%s4610_s2 + $0x4] sm:$0xf0]  ;;  %v1434_v51 = vld [vmem:[%s4611_s3 + $0x78] sm:$0xff] }
 0x17c   : > { %1891 = vmatpush.bf16.msra.mxu2 %v1378_v36  ;;  %1793 = vmatpush.bf16.msra.mxu0 %v1377_v18  ;;  %v3797_v36 = vor.u32 %v3031_v2, %v2907_v7 }
 0x17d   : > { %1512 = vperm.xlu0 %3114, %v1434_v51  }
 0x17e   : > { %v3718_v29 = vpop.f32.mrf.mxu3  ;;  %v3720_v30 = vpop.f32.mrf.mxu2  ;;  %4635 = vst [vmem:[#allocation12_spill] sm:$0xff] %v3797_v36  ;;  %1603 = vmatmul.bf16.vlgmr.msrb.gmra.mxu0 %v3797_v36  ;;  %1701 = vmatmul.bf16.vlgmr.msrb.gmra.mxu2 %v3797_v36 }
 0x17f   : > { %v3714_v37 = vpop.f32.mrf.mxu0  ;;  %v3716_v22 = vpop.f32.mrf.mxu1 }
 0x180   : > { %1892 = vmatpush.bf16.msra.mxu2 %v1374_v20  ;;  %1794 = vmatpush.bf16.msra.mxu0 %v1373_v21 }
 0x184   : > { %1893 = vmatpush.bf16.msra.mxu2 %v3664_v53  ;;  %1795 = vmatpush.bf16.msra.mxu0 %v1369_v54 }
 0x185   : > { %1477 = vperm.xlu0 %3114, %v1427_v42   ;;  %v3033_v42 = vld [vmem:[%s4610_s2 + $0x14] sm:$0xf0] }
 0x186   : > { %v3729_v5 = vpop.f32.mrf.mxu3  ;;  %v3731_v55 = vpop.f32.mrf.mxu2 }
 0x187   : > { %v3725_v49 = vpop.f32.mrf.mxu0  ;;  %v3727_v52 = vpop.f32.mrf.mxu1 }
 0x188   : > { %1894 = vmatpush.bf16.msra.mxu2 %v3640_v50  ;;  %1796 = vmatpush.bf16.msra.mxu0 %v3650_v44 }
 0x18c   : > { %1895 = vmatpush.bf16.msra.mxu2 %v3618_v32  ;;  %1797 = vmatpush.bf16.msra.mxu0 %v3628_v41 }
 0x18e   : > { %v3741_v44 = vpop.f32.mrf.mxu3  ;;  %v3743_v8 = vpop.f32.mrf.mxu2 }
 0x18f   : > { %v3737_v53 = vpop.f32.mrf.mxu0  ;;  %v3739_v50 = vpop.f32.mrf.mxu1 }
 0x190   : > { %1896 = vmatpush.bf16.msra.mxu2 %v3592_v16  ;;  %1798 = vmatpush.bf16.msra.mxu0 %v3606_v23 }
 0x196   : > { %v3749_v3 = vpop.f32.mrf.mxu3  ;;  %v3751_v32 = vpop.f32.mrf.mxu2 }
 0x197   : > { %v3745_v9 = vpop.f32.mrf.mxu0  ;;  %v3747_v11 = vpop.f32.mrf.mxu1 }
 0x19e   : > { %v3757_v23 = vpop.f32.mrf.mxu3  ;;  %v3759_v4 = vpop.f32.mrf.mxu2 }
 0x19f   : > { %v3753_v41 = vpop.f32.mrf.mxu0  ;;  %v3755_v16 = vpop.f32.mrf.mxu1 }
 0x1a6   : > { %v3765_v6 = vpop.f32.mrf.mxu3  ;;  %v3767_v15 = vpop.f32.mrf.mxu2 }
 0x1a7   : > { %v3761_v54 = vpop.f32.mrf.mxu0  ;;  %v3763_v63 = vpop.f32.mrf.mxu1 }
 0x1ae   : > { %v3773_v10 = vpop.f32.mrf.mxu3  ;;  %v3775_v14 = vpop.f32.mrf.mxu2 }
 0x1af   : > { %v3769_v57 = vpop.f32.mrf.mxu0  ;;  %v3771_v62 = vpop.f32.mrf.mxu1 }
 0x1b6   : > { %v3777_v60 = vpop.f32.mrf.mxu3  ;;  %v3779_v31 = vpop.f32.mrf.mxu2 }
 0x1b7   : > { %v934_v17 = vpop.f32.mrf.mxu0  ;;  %v1023_v59 = vpop.f32.mrf.mxu1 }
 0x1be   : > { %v3784_v28 = vpop.f32.mrf.mxu3  ;;  %v3786_v1 = vpop.f32.mrf.mxu2 }
 0x1bf   : > { %v936_v43 = vpop.f32.mrf.mxu0  ;;  %v1025_v27 = vpop.f32.mrf.mxu1 }
 0x1c0   : > { %v1327_v36 = vmax.f32 %v936_v43, 0.0  ;;  %v1328_v25 = vmax.f32 %v1025_v27, 0.0  ;;  %v1426_v43 = vld [vmem:[%s4611_s3 + $0x38] sm:$0xff]  ;;  %v1323_v27 = vmax.f32 %v934_v17, 0.0 }
 0x1c1   : > { %1472 = vperm.xlu0 %3114, %v1426_v43  }
 0x1c6   : > { %v3801_v39 = vpop.f32.mrf.mxu3  ;;  %v3803_v40 = vpop.f32.mrf.mxu2 }
 0x1c7   : > { %v939_v18 = vpop.f32.mrf.mxu0  ;;  %v1028_v19 = vpop.f32.mrf.mxu1 }
 0x1c8   : > { %v1331_v24 = vmax.f32 %v939_v18, 0.0  ;;  %v1332_v58 = vmax.f32 %v1028_v19, 0.0  ;;  %v1431_v18 = vld [vmem:[%s4611_s3 + $0x60] sm:$0xff]  ;;  %v3821_v19 = vor.u32 %v3033_v42, %v2915_v34 }
 0x1c9   : > { %1497 = vperm.xlu1 %3115, %v1431_v18  }
 0x1ca   : > { %1608 = vmatmul.bf16.gmra.mxu0 %v3821_v19  ;;  %1706 = vmatmul.bf16.gmra.mxu2 %v3821_v19 }
 0x1ce   : > { %v3808_v51 = vpop.f32.mrf.mxu3  ;;  %v3810_v13 = vpop.f32.mrf.mxu2 }
 0x1cf   : > { %v941_v20 = vpop.f32.mrf.mxu0  ;;  %v1030_v21 = vpop.f32.mrf.mxu1 }
 0x1d0   : > { %v1335_v7 = vmax.f32 %v941_v20, 0.0  ;;  %v1336_v2 = vmax.f32 %v1030_v21, 0.0  ;;  %v1324_v20 = vmax.f32 %v1023_v59, 0.0  ;;  %v1319_v21 = vmax.f32 %v3769_v57, 0.0 }
 0x1d1   : > { %v1312_v59 = vmax.f32 %v3755_v16, 0.0  ;;  %v1308_v16 = vmax.f32 %v3747_v11, 0.0  ;;  %v1296_v11 = vmax.f32 %v3716_v22, 0.0  ;;  %v1291_v22 = vmax.f32 %v3706_v61, 0.0 }
 0x1d2   : > { %v1415_v45 = vpack.c.bf16 %v1335_v7, %v1331_v24  ;;  %v1416_v38 = vpack.c.bf16 %v1336_v2, %v1332_v58  ;;  %v1320_v24 = vmax.f32 %v3771_v62, 0.0  ;;  %v1411_v58 = vpack.c.bf16 %v1327_v36, %v1323_v27 }
 0x1d3   : > { %v1412_v34 = vpack.c.bf16 %v1328_v25, %v1324_v20  ;;  %v1315_v7 = vmax.f32 %v3761_v54, 0.0  ;;  %v1316_v2 = vmax.f32 %v3763_v63, 0.0  ;;  %v1432_v25 = vld [vmem:[%s4611_s3 + $0x68] sm:$0xff]  ;;  %v1429_v54 = vld [vmem:[%s4611_s3 + $0x50] sm:$0xff]  ;;  %v1303_v62 = vmax.f32 %v3737_v53, 0.0 }
 0x1d4   : > { %1644 = vmatpush.bf16.msrb.mxu1 %v1415_v45  ;;  %1742 = vmatpush.bf16.msrb.mxu3 %v1416_v38  ;;  %v1311_v45 = vmax.f32 %v3753_v41, 0.0  ;;  %v1421_v63 = vld [vmem:[%s4611_s3 + $0x10] sm:$0xff]  ;;  %v1307_v41 = vmax.f32 %v3745_v9, 0.0  ;;  %v1304_v36 = vmax.f32 %v3739_v50, 0.0  ;;  %v1404_v43 = vpack.c.bf16 %v1312_v59, %v1308_v16  ;;  %v2923_v53 = vld [vmem:[%s4610_s2 + $0x20] sm:$0xf] }
 0x1d5   : > { %v1407_v57 = vpack.c.bf16 %v1319_v21, %v1315_v7  ;;  %v1408_v42 = vpack.c.bf16 %v1320_v24, %v1316_v2  ;;  %1502 = vperm.xlu1 %3115, %v1432_v25   ;;  %1487 = vperm.xlu2 %3116, %v1429_v54   ;;  %v1299_v27 = vmax.f32 %v3725_v49, 0.0  ;;  %v1300_v20 = vmax.f32 %v3727_v52, 0.0  ;;  %v3035_v49 = vld [vmem:[%s4610_s2 + $0x24] sm:$0xf0] }
 0x1d6   : > { %v3832_v17 = vpop.f32.mrf.mxu3  ;;  %v3834_v38 = vpop.f32.mrf.mxu2  ;;  %v1403_v18 = vpack.c.bf16 %v1311_v45, %v1307_v41  ;;  %1447 = vperm.xlu0 %3114, %v1421_v63   ;;  %v1295_v9 = vmax.f32 %v3714_v37, 0.0  ;;  %v1428_v52 = vld [vmem:[%s4611_s3 + $0x48] sm:$0xff]  ;;  %v3864_v50 = vor.u32 %v3035_v49, %v2923_v53  ;;  %v1430_v37 = vld [vmem:[%s4611_s3 + $0x58] sm:$0xff]  ;;  %v1292_v7 = vmax.f32 %v3708_v48, 0.0 }
 0x1d7   : > { %v1420_v2 = vld [vmem:[%s4611_s3 + $0x8] sm:$0xff]  ;;  %v1287_v45 = vmax.f32 %v3688_v26, 0.0  ;;  %v1288_v59 = vmax.f32 %v3690_v46, 0.0  ;;  %v1279_v61 = vmax.f32 %v3672_v56, 0.0  ;;  %v1280_v48 = vmax.f32 %v3674_v33, 0.0  ;;  %v1423_v56 = vld [vmem:[%s4611_s3 + $0x20] sm:$0xff] }
 0x1d8   : > { %1645 = vmatpush.bf16.msrb.mxu1 %v1411_v58  ;;  %1743 = vmatpush.bf16.msrb.mxu3 %v1412_v34  ;;  %v1399_v58 = vpack.c.bf16 %v1303_v62, %v1299_v27  ;;  %v1400_v34 = vpack.c.bf16 %v1304_v36, %v1300_v20  ;;  %v1283_v25 = vmax.f32 %v3678_v0, 0.0  ;;  %v1284_v54 = vmax.f32 %v3680_v12, 0.0  ;;  %v1425_v12 = vld [vmem:[%s4611_s3 + $0x30] sm:$0xff]  ;;  %v2909_v27 = vld [vmem:[%s4610_s2 + $0x8] sm:$0xf0] }
 0x1d9   : > { %v1275_v33 = vmax.f32 %v3655_v47, 0.0  ;;  %v1276_v0 = vmax.f32 %v3657_v35, 0.0  ;;  %v1326_v35 = vmax.f32 %v3808_v51, 0.0  ;;  %v1318_v53 = vmax.f32 %v3784_v28, 0.0  ;;  %v1422_v28 = vld [vmem:[%s4611_s3 + $0x18] sm:$0xff] }
 0x1da   : > { %1613 = vmatmul.bf16.gmra.mxu0 %v3864_v50  ;;  %1711 = vmatmul.bf16.gmra.mxu2 %v3864_v50  ;;  %v1391_v36 = vpack.c.bf16 %v1287_v45, %v1283_v25  ;;  %v1317_v49 = vmax.f32 %v3786_v1, 0.0  ;;  %v1321_v51 = vmax.f32 %v3803_v40, 0.0  ;;  %v1310_v40 = vmax.f32 %v3773_v10, 0.0 }
 0x1db   : > { %v1387_v20 = vpack.c.bf16 %v1279_v61, %v1275_v33  ;;  %v1313_v45 = vmax.f32 %v3779_v31, 0.0  ;;  %v1306_v10 = vmax.f32 %v3765_v6, 0.0  ;;  %v1305_v61 = vmax.f32 %v3767_v15, 0.0  ;;  %v4638_v33 = vld [vmem:[#allocation10_spill] sm:$0xff] }
 0x1dc   : > { %1646 = vmatpush.bf16.msrb.mxu1 %v1407_v57  ;;  %1744 = vmatpush.bf16.msrb.mxu3 %v1408_v42  ;;  %v1395_v57 = vpack.c.bf16 %v1295_v9, %v1291_v22  ;;  %v1396_v42 = vpack.c.bf16 %v1296_v11, %v1292_v7  ;;  %v1325_v9 = vmax.f32 %v3810_v13, 0.0  ;;  %v1330_v11 = vmax.f32 %v3832_v17, 0.0  ;;  %v2931_v13 = vld [vmem:[%s4610_s2 + $0x30] sm:$0xf]  ;;  %v3037_v17 = vld [vmem:[%s4610_s2 + $0x34] sm:$0xf0] }
 0x1dd   : > { %1482 = vperm.xlu1 %3115, %v1428_v52   ;;  %1492 = vperm.xlu2 %3116, %v1430_v37   ;;  %v1322_v52 = vmax.f32 %v3801_v39, 0.0  ;;  %v3917_v1 = vor.u32 %v3037_v17, %v2931_v13  ;;  %v1424_v39 = vld [vmem:[%s4611_s3 + $0x28] sm:$0xff]  ;;  %v1309_v7 = vmax.f32 %v3775_v14, 0.0  ;;  %v3032_v14 = vld [vmem:[%s4610_s2 + $0x14] sm:$0xf]  ;;  %v1294_v31 = vmax.f32 %v3741_v44, 0.0 }
 0x1de   : > { %v1206_v21 = vpop.f32.mrf.mxu3  ;;  %v1117_v24 = vpop.f32.mrf.mxu2  ;;  %1442 = vperm.xlu0 %3114, %v1420_v2   ;;  %v1314_v2 = vmax.f32 %v3777_v60, 0.0  ;;  %v2917_v60 = vld [vmem:[%s4610_s2 + $0x18] sm:$0xf0]  ;;  %v1285_v44 = vmax.f32 %v3720_v30, 0.0  ;;  %v3038_v17 = vld [vmem:[%s4610_s2 + $0x44] sm:$0xf] }
 0x1df   : > { %v1334_v16 = vmax.f32 %v1206_v21, 0.0  ;;  %v1333_v26 = vmax.f32 %v1117_v24, 0.0  ;;  %v1388_v21 = vpack.c.bf16 %v1280_v48, %v1276_v0  ;;  %v1410_v22 = vpack.c.bf16 %v1322_v52, %v1318_v53  ;;  %v2933_v53 = vld [vmem:[%s4610_s2 + $0x38] sm:$0xf0]  ;;  %v2955_v52 = vld [vmem:[%s4610_s2 + $0x60] sm:$0xf] }
 0x1e0   : > { %1647 = vmatpush.bf16.msrb.mxu1 %v1403_v18  ;;  %1745 = vmatpush.bf16.msrb.mxu3 %v1404_v43  ;;  %v1392_v18 = vpack.c.bf16 %v1288_v59, %v1284_v54  ;;  %v3030_v43 = vld [vmem:[%s4610_s2 + $0x4] sm:$0xf]  ;;  %v1409_v59 = vpack.c.bf16 %v1321_v51, %v1317_v49  ;;  %v1406_v48 = vpack.c.bf16 %v1314_v2, %v1310_v40  ;;  %v1293_v54 = vmax.f32 %v3743_v8, 0.0  ;;  %v3043_v51 = vld [vmem:[%s4610_s2 + $0x64] sm:$0xf0] }
 0x1e1   : > { %v1405_v25 = vpack.c.bf16 %v1313_v45, %v1309_v7  ;;  %v3941_v15 = vor.u32 %v3032_v14, %v2917_v60  ;;  %v1282_v0 = vmax.f32 %v4638_v33, 0.0  ;;  %v4003_v13 = vor.u32 %v3043_v51, %v2955_v52  ;;  %v2949_v7 = vld [vmem:[%s4610_s2 + $0x58] sm:$0xf0] }
 0x1e4   : > { %1648 = vmatpush.bf16.msrb.mxu1 %v1399_v58  ;;  %1746 = vmatpush.bf16.msrb.mxu3 %v1400_v34  ;;  %v1329_v58 = vmax.f32 %v3834_v38, 0.0  ;;  %v3900_v34 = vor.u32 %v3030_v43, %v2909_v27  ;;  %v1414_v38 = vpack.c.bf16 %v1330_v11, %v1326_v35  ;;  %v2947_v35 = vld [vmem:[%s4610_s2 + $0x50] sm:$0xf] }
 0x1e5   : > { %1457 = vperm.xlu1 %3115, %v1423_v56   ;;  %1467 = vperm.xlu2 %3116, %v1425_v12   ;;  %v4639_v12 = vld [vmem:[#allocation11_spill] sm:$0xff] }
 0x1e6   : > { %v1208_v63 = vpop.f32.mrf.mxu3  ;;  %v1119_v41 = vpop.f32.mrf.mxu2  ;;  %v1413_v37 = vpack.c.bf16 %v1329_v58, %v1325_v9  ;;  %v1281_v43 = vmax.f32 %v4639_v12, 0.0  ;;  %v3041_v9 = vld [vmem:[%s4610_s2 + $0x54] sm:$0xf0]  ;;  %v3036_v58 = vld [vmem:[%s4610_s2 + $0x34] sm:$0xf] }
 0x1e7   : > { %v1338_v62 = vmax.f32 %v1208_v63, 0.0  ;;  %v1337_v46 = vmax.f32 %v1119_v41, 0.0  ;;  %v1298_v63 = vmax.f32 %v3749_v3, 0.0  ;;  %v1297_v41 = vmax.f32 %v3751_v32, 0.0  ;;  %v4035_v45 = vpop.permute.xlu0 %1507 }
 0x1e8   : > { %1649 = vmatpush.bf16.msrb.mxu1 %v1395_v57  ;;  %1747 = vmatpush.bf16.msrb.mxu3 %v1396_v42  ;;  %v1302_v57 = vmax.f32 %v3757_v23, 0.0  ;;  %v1301_v42 = vmax.f32 %v3759_v4, 0.0  ;;  %v1419_v23 = vld [vmem:[%s4611_s3] sm:$0xff]  ;;  %v1290_v3 = vmax.f32 %v3729_v5, 0.0  ;;  %v1289_v32 = vmax.f32 %v3731_v55, 0.0 }
 0x1e9   : > { %v1418_v47 = vpack.c.bf16 %v1338_v62, %v1334_v16  ;;  %v1417_v24 = vpack.c.bf16 %v1337_v46, %v1333_v26  ;;  %v2939_v16 = vld [vmem:[%s4610_s2 + $0x40] sm:$0xf]  ;;  %v3039_v26 = vld [vmem:[%s4610_s2 + $0x44] sm:$0xf0]  ;;  %v1286_v62 = vmax.f32 %v3718_v29, 0.0  ;;  %v1398_v46 = vpack.c.bf16 %v1298_v63, %v1294_v31 }
 0x1ea   : > { %1618 = vmatmul.bf16.gmra.mxu0 %v3917_v1  ;;  %1716 = vmatmul.bf16.gmra.mxu2 %v3917_v1  ;;  %v1402_v4 = vpack.c.bf16 %v1306_v10, %v1302_v57  ;;  %v1401_v6 = vpack.c.bf16 %v1305_v61, %v1301_v42  ;;  %v3957_v8 = vor.u32 %v3039_v26, %v2939_v16  ;;  %v4636_v29 = vld [vmem:[#allocation8_spill] sm:$0xff]  ;;  %v3042_v61 = vld [vmem:[%s4610_s2 + $0x64] sm:$0xf]  ;;  %v2965_v16 = vld [vmem:[%s4610_s2 + $0x78] sm:$0xf0] }
 0x1eb   : > { %v1278_v30 = vmax.f32 %v4636_v29, 0.0  ;;  %v1394_v27 = vpack.c.bf16 %v1290_v3, %v1286_v62  ;;  %v1393_v5 = vpack.c.bf16 %v1289_v32, %v1285_v44  ;;  %v3983_v11 = vor.u32 %v3041_v9, %v2947_v35  ;;  %v4640_v57 = vld [vmem:[#allocation12_spill] sm:$0xff] }
 0x1ec   : > { %1650 = vmatpush.bf16.msrb.mxu1 %v1391_v36  ;;  %1748 = vmatpush.bf16.msrb.mxu3 %v1392_v18  ;;  %v1397_v36 = vpack.c.bf16 %v1297_v41, %v1293_v54  ;;  %v4637_v18 = vld [vmem:[#allocation9_spill] sm:$0xff]  ;;  %v3993_v49 = vor.u32 %v3036_v58, %v2933_v53 }
 0x1ed   : > { %1452 = vperm.xlu1 %3115, %v1422_v28   ;;  %1462 = vperm.xlu2 %3116, %v1424_v39   ;;  %v1277_v56 = vmax.f32 %v4637_v18, 0.0  ;;  %v1390_v55 = vpack.c.bf16 %v1282_v0, %v1278_v30  ;;  %v2963_v28 = vld [vmem:[%s4610_s2 + $0x70] sm:$0xf]  ;;  %v3045_v39 = vld [vmem:[%s4610_s2 + $0x74] sm:$0xf0] }
 0x1ee   : > { %v4023_v40 = vor.u32 %v3045_v39, %v2963_v28  ;;  %v3044_v41 = vld [vmem:[%s4610_s2 + $0x74] sm:$0xf] }
 0x1ef   : > { %v4071_v62 = vor.u32 %v3044_v41, %v2965_v16 }
 0x1f0   : > { %1651 = vmatpush.bf16.msrb.mxu1 %v1387_v20  ;;  %1749 = vmatpush.bf16.msrb.mxu3 %v1388_v21  ;;  %v1389_v20 = vpack.c.bf16 %v1281_v43, %v1277_v56  ;;  %v3034_v21 = vld [vmem:[%s4610_s2 + $0x24] sm:$0xf] }
 0x1f3   : > { %1652 = vmatmul.bf16.vlgmr.msrb.gmra.mxu1 %v3900_v34  ;;  %1750 = vmatmul.bf16.vlgmr.msrb.gmra.mxu3 %v3900_v34 }
 0x1f4   : > { %1938 = vmatpush.bf16.msra.mxu3 %v1418_v47  ;;  %1840 = vmatpush.bf16.msra.mxu1 %v1417_v24  ;;  %v2925_v47 = vld [vmem:[%s4610_s2 + $0x28] sm:$0xf0] }
 0x1f5   : > { %1437 = vperm.xlu2 %3116, %v1419_v23   ;;  %v3973_v24 = vor.u32 %v3034_v21, %v2925_v47 }
 0x1f8   : > { %1939 = vmatpush.bf16.msra.mxu3 %v1414_v38  ;;  %1841 = vmatpush.bf16.msra.mxu1 %v1413_v37  ;;  %v2941_v38 = vld [vmem:[%s4610_s2 + $0x48] sm:$0xf0] }
 0x1f9   : > { %v4013_v37 = vor.u32 %v3038_v17, %v2941_v38 }
 0x1fa   : > { %1623 = vmatmul.bf16.gmra.mxu0 %v3957_v8  ;;  %1721 = vmatmul.bf16.gmra.mxu2 %v3957_v8 }
 0x1fb   : > { %v1604_v42 = vpop.f32.mrf.mxu0 }
 0x1fc   : > { %1940 = vmatpush.bf16.msra.mxu3 %v1410_v22  ;;  %1842 = vmatpush.bf16.msra.mxu1 %v1409_v59  ;;  %v3040_v22 = vld [vmem:[%s4610_s2 + $0x54] sm:$0xf] }
 0x1fd   : > { %v4033_v2 = vor.u32 %v3040_v22, %v2949_v7 }
 0x200   : > { %1941 = vmatpush.bf16.msra.mxu3 %v1406_v48  ;;  %1843 = vmatpush.bf16.msra.mxu1 %v1405_v25  ;;  %v2957_v48 = vld [vmem:[%s4610_s2 + $0x68] sm:$0xf0]  ;;  %v4049_v25 = vpop.permute.xlu0 %1512 }
 0x201   : > { %v1702_v10 = vpop.f32.mrf.mxu2  ;;  %v4053_v60 = vor.u32 %v3042_v61, %v2957_v48 }
 0x203   : > { %1657 = vmatmul.bf16.gmra.mxu1 %v3941_v15  ;;  %1755 = vmatmul.bf16.gmra.mxu3 %v3941_v15  ;;  %v1606_v23 = vpop.f32.mrf.mxu0 }
 0x204   : > { %1942 = vmatpush.bf16.msra.mxu3 %v1402_v4  ;;  %1844 = vmatpush.bf16.msra.mxu1 %v1401_v6 }
 0x208   : > { %1943 = vmatpush.bf16.msra.mxu3 %v1398_v46  ;;  %1845 = vmatpush.bf16.msra.mxu1 %v1397_v36  ;;  %v4059_v6 = vpop.permute.xlu0 %1477 }
 0x209   : > { %v1704_v4 = vpop.f32.mrf.mxu2  ;;  %4641 = vst [vmem:[#allocation8_spill] sm:$0xff] %v4059_v6 }
 0x20a   : > { %1628 = vmatmul.bf16.gmra.mxu0 %v3983_v11  ;;  %1726 = vmatmul.bf16.gmra.mxu2 %v3983_v11 }
 0x20c   : > { %1944 = vmatpush.bf16.msra.mxu3 %v1394_v27  ;;  %1846 = vmatpush.bf16.msra.mxu1 %v1393_v5 }
 0x210   : > { %1945 = vmatpush.bf16.msra.mxu3 %v1390_v55  ;;  %1847 = vmatpush.bf16.msra.mxu1 %v1389_v20 }
 0x213   : > { %1662 = vmatmul.bf16.gmra.mxu1 %v3973_v24  ;;  %1760 = vmatmul.bf16.gmra.mxu3 %v3973_v24 }
 0x21a   : > { %1633 = vmatmul.bf16.gmra.mxu0 %v4003_v13  ;;  %1731 = vmatmul.bf16.gmra.mxu2 %v4003_v13 }
 0x223   : > { %1667 = vmatmul.bf16.gmra.mxu1 %v3993_v49  ;;  %1765 = vmatmul.bf16.gmra.mxu3 %v3993_v49 }
 0x22a   : > { %1638 = vmatmul.bf16.gmra.mxu0 %v4023_v40  ;;  %1736 = vmatmul.bf16.gmra.mxu2 %v4023_v40 }
 0x22f   : > { %v4037_v59 = vpop.permute.xlu2 %1487 }
 0x233   : > { %1672 = vmatmul.bf16.gmra.mxu1 %v4013_v37  ;;  %1770 = vmatmul.bf16.gmra.mxu3 %v4013_v37  ;;  %v4073_v44 = vpop.permute.xlu0 %1472 }
 0x234   : > { %4643 = vst [vmem:[#allocation10_spill] sm:$0xff] %v4073_v44 }
 0x237   : > { %v4051_v14 = vpop.permute.xlu2 %1492 }
 0x23a   : > { %1799 = vmatmul.bf16.vlgmr.msra.gmra.mxu0 %v4640_v57  ;;  %1897 = vmatmul.bf16.vlgmr.msra.gmra.mxu2 %v4640_v57 }
 0x23b   : > { %v4069_v26 = vpop.permute.xlu1 %1497 }
 0x23f   : > { %v4061_v31 = vpop.permute.xlu2 %1467 }
 0x240   : > { %4642 = vst [vmem:[#allocation9_spill] sm:$0xff] %v4061_v31 }
 0x243   : > { %1677 = vmatmul.bf16.gmra.mxu1 %v4033_v2  ;;  %1775 = vmatmul.bf16.gmra.mxu3 %v4033_v2 }
 0x247   : > { %v1609_v54 = vpop.f32.mrf.mxu0  ;;  %v4081_v46 = vpop.permute.xlu1 %1502 }
 0x248   : > { %v4085_v30 = vpop.permute.xlu0 %1447 }
 0x249   : > { %v1610_v51 = vadd.f32 %v1609_v54, %v4085_v30 }
 0x24a   : > { %1804 = vmatmul.bf16.gmra.mxu0 %v3821_v19  ;;  %1902 = vmatmul.bf16.gmra.mxu2 %v3821_v19  ;;  %v4075_v19 = vpop.permute.xlu2 %1462 }
 0x24b   : > { %4644 = vst [vmem:[#allocation11_spill] sm:$0xff] %v4075_v19 }
 0x24d   : > { %v1707_v63 = vpop.f32.mrf.mxu2 }
 0x24e   : > { %v1708_v61 = vadd.f32 %v1707_v63, %v4085_v30 }
 0x24f   : > { %v1611_v3 = vpop.f32.mrf.mxu0  ;;  %v4090_v0 = vpop.permute.xlu1 %1482 }
 0x250   : > { %v4099_v5 = vpop.permute.xlu0 %1442 }
 0x251   : > { %v1607_v20 = vadd.f32 %v1606_v23, %v4099_v5  ;;  %v1705_v17 = vadd.f32 %v1704_v4, %v4099_v5 }
 0x252   : > { %v4087_v18 = vpop.permute.xlu2 %1437 }
 0x253   : > { %1682 = vmatmul.bf16.gmra.mxu1 %v4053_v60  ;;  %1780 = vmatmul.bf16.gmra.mxu3 %v4053_v60  ;;  %v1605_v56 = vadd.f32 %v1604_v42, %v4087_v18 }
 0x255   : > { %v1709_v32 = vpop.f32.mrf.mxu2 }
 0x257   : > { %v1614_v36 = vpop.f32.mrf.mxu0  ;;  %v4106_v53 = vpop.permute.xlu1 %1457 }
 0x25a   : > { %1809 = vmatmul.bf16.gmra.mxu0 %v3864_v50  ;;  %1907 = vmatmul.bf16.gmra.mxu2 %v3864_v50  ;;  %v1703_v50 = vadd.f32 %v1702_v10, %v4087_v18 }
 0x25d   : > { %v4083_v29 = vpop.f32.mrf.mxu2 }
 0x25f   : > { %v4092_v12 = vpop.f32.mrf.mxu0  ;;  %v4121_v23 = vpop.permute.xlu1 %1452 }
 0x260   : > { %v1612_v54 = vadd.f32 %v1611_v3, %v4121_v23 }
 0x263   : > { %1687 = vmatmul.bf16.gmra.mxu1 %v4071_v62  ;;  %1785 = vmatmul.bf16.gmra.mxu3 %v4071_v62 }
 0x265   : > { %v4094_v43 = vpop.f32.mrf.mxu2 }
 0x267   : > { %v1619_v35 = vpop.f32.mrf.mxu0 }
 0x26a   : > { %1814 = vmatmul.bf16.gmra.mxu0 %v3917_v1  ;;  %1912 = vmatmul.bf16.gmra.mxu2 %v3917_v1 }
 0x26d   : > { %v4104_v9 = vpop.f32.mrf.mxu2 }
 0x26f   : > { %v4112_v22 = vpop.f32.mrf.mxu0 }
 0x270   : > { %v1653_v33 = vpop.f32.mrf.mxu1 }
 0x271   : > { %v1654_v27 = vadd.f32 %v1653_v33, %v1605_v56 }
 0x273   : > { %1848 = vmatmul.bf16.vlgmr.msra.gmra.mxu1 %v3900_v34  ;;  %1946 = vmatmul.bf16.vlgmr.msra.gmra.mxu3 %v3900_v34  ;;  %v1987_v34 = vmax.f32 %v1654_v27, 0.0 }
 0x275   : > { %v4114_v7 = vpop.f32.mrf.mxu2 }
 0x276   : > { %v1751_v55 = vpop.f32.mrf.mxu3 }
 0x277   : > { %v1752_v21 = vadd.f32 %v1751_v55, %v1703_v50  ;;  %v4126_v56 = vpop.f32.mrf.mxu0  ;;  %v1615_v50 = vadd.f32 %v1614_v36, %v4106_v53  ;;  %v1710_v55 = vadd.f32 %v1709_v32, %v4121_v23  ;;  %v1713_v36 = vadd.f32 %v4083_v29, %v4106_v53 }
 0x278   : > { %v1655_v47 = vpop.f32.mrf.mxu1  ;;  %v1620_v29 = vadd.f32 %v1619_v35, %v4061_v31 }
 0x279   : > { %v1656_v58 = vadd.f32 %v1655_v47, %v1607_v20  ;;  %v1988_v42 = vmax.f32 %v1752_v21, 0.0 }
 0x27a   : > { %1819 = vmatmul.bf16.gmra.mxu0 %v3957_v8  ;;  %1917 = vmatmul.bf16.gmra.mxu2 %v3957_v8 }
 0x27b   : > { %v1991_v52 = vmax.f32 %v1656_v58, 0.0 }
 0x27d   : > { %v4110_v38 = vpack.c.bf16 %v1991_v52, %v1987_v34  ;;  %v4128_v33 = vpop.f32.mrf.mxu2 }
 0x27e   : > { %v1753_v28 = vpop.f32.mrf.mxu3 }
 0x27f   : > { %v1754_v1 = vadd.f32 %v1753_v28, %v1705_v17  ;;  %v4134_v58 = vpop.f32.mrf.mxu0  ;;  %v1617_v28 = vadd.f32 %v4092_v12, %v4075_v19 }
 0x280   : > { %v1658_v39 = vpop.f32.mrf.mxu1 }
 0x281   : > { %v1659_v57 = vadd.f32 %v1658_v39, %v1610_v51  ;;  %v1992_v10 = vmax.f32 %v1754_v1, 0.0 }
 0x283   : > { %1853 = vmatmul.bf16.gmra.mxu1 %v3941_v15  ;;  %1951 = vmatmul.bf16.gmra.mxu3 %v3941_v15  ;;  %v4119_v48 = vpack.c.bf16 %v1992_v10, %v1988_v42  ;;  %v1995_v27 = vmax.f32 %v1659_v57, 0.0 }
 0x285   : > { %4645 = vst [vmem:[#allocation12_spill] sm:$0xff] %v4119_v48  ;;  %v4136_v3 = vpop.f32.mrf.mxu2 }
 0x286   : > { %v1756_v4 = vpop.f32.mrf.mxu3 }
 0x287   : > { %v1757_v41 = vadd.f32 %v1756_v4, %v1708_v61  ;;  %v4148_v57 = vpop.f32.mrf.mxu0  ;;  %v1715_v4 = vadd.f32 %v4094_v43, %v4075_v19  ;;  %v1718_v43 = vadd.f32 %v4104_v9, %v4061_v31 }
 0x288   : > { %v1660_v16 = vpop.f32.mrf.mxu1 }
 0x289   : > { %v1661_v15 = vadd.f32 %v1660_v16, %v1612_v54  ;;  %v1996_v52 = vmax.f32 %v1757_v41, 0.0 }
 0x28a   : > { %1824 = vmatmul.bf16.gmra.mxu0 %v3983_v11  ;;  %1922 = vmatmul.bf16.gmra.mxu2 %v3983_v11 }
 0x28b   : > { %v1999_v63 = vmax.f32 %v1661_v15, 0.0 }
 0x28d   : > { %v4132_v20 = vpack.c.bf16 %v1999_v63, %v1995_v27  ;;  %v4150_v42 = vpop.f32.mrf.mxu2 }
 0x28e   : > { %v1758_v21 = vpop.f32.mrf.mxu3 }
 0x28f   : > { %v1759_v47 = vadd.f32 %v1758_v21, %v1710_v55  ;;  %v4157_v12 = vpop.f32.mrf.mxu0  ;;  %v2091_v55 = vld [vmem:[%s4613_s5] sm:$0xff] }
 0x290   : > { %v1663_v8 = vpop.f32.mrf.mxu1  ;;  %2101 = vperm.xlu1 %3115, %v2091_v55   ;;  %v1632_v19 = vadd.f32 %v4157_v12, %v4051_v14 }
 0x291   : > { %v1664_v34 = vadd.f32 %v1663_v8, %v1615_v50  ;;  %v2000_v51 = vmax.f32 %v1759_v47, 0.0  ;;  %v2093_v47 = vld [vmem:[%s4613_s5 + $0x10] sm:$0xff]  ;;  %v1622_v8 = vadd.f32 %v4112_v22, %v4073_v44  ;;  %v1720_v22 = vadd.f32 %v4114_v7, %v4073_v44  ;;  %v2095_v7 = vld [vmem:[%s4613_s5 + $0x20] sm:$0xff] }
 0x292   : > { %2111 = vperm.xlu0 %3114, %v2093_v47   ;;  %v2363_v47 = vld [vmem:[%s4615_s7 + $0x20] sm:$0xff] }
 0x293   : > { %1858 = vmatmul.bf16.gmra.mxu1 %v3973_v24  ;;  %1956 = vmatmul.bf16.gmra.mxu3 %v3973_v24  ;;  %v4142_v32 = vpack.c.bf16 %v2000_v51, %v1996_v52  ;;  %v2003_v10 = vmax.f32 %v1664_v34, 0.0  ;;  %v2094_v51 = vld [vmem:[%s4613_s5 + $0x18] sm:$0xff] }
 0x295   : > { %v4159_v50 = vpop.f32.mrf.mxu2 }
 0x296   : > { %v1761_v17 = vpop.f32.mrf.mxu3 }
 0x297   : > { %v1762_v1 = vadd.f32 %v1761_v17, %v1713_v36  ;;  %v4177_v52 = vpop.f32.mrf.mxu0 }
 0x298   : > { %v1665_v39 = vpop.f32.mrf.mxu1  ;;  %2116 = vperm.xlu1 %3115, %v2094_v51   ;;  %v2359_v51 = vld [vmem:[%s4615_s7] sm:$0xff] }
 0x299   : > { %v1666_v24 = vadd.f32 %v1665_v39, %v1617_v28  ;;  %v2004_v27 = vmax.f32 %v1762_v1, 0.0  ;;  %v1625_v28 = vadd.f32 %v4126_v56, %v4059_v6  ;;  %v1723_v56 = vadd.f32 %v4128_v33, %v4059_v6 }
 0x29a   : > { %1829 = vmatmul.bf16.gmra.mxu0 %v4003_v13  ;;  %1927 = vmatmul.bf16.gmra.mxu2 %v4003_v13 }
 0x29b   : > { %v2007_v61 = vmax.f32 %v1666_v24, 0.0  ;;  %v2360_v24 = vld [vmem:[%s4615_s7 + $0x8] sm:$0xff] }
 0x29c   : > { %2374 = vperm.xlu0 %3114, %v2360_v24  }
 0x29d   : > { %v4155_v54 = vpack.c.bf16 %v2007_v61, %v2003_v10  ;;  %v4182_v13 = vpop.f32.mrf.mxu2 }
 0x29e   : > { %v1763_v11 = vpop.f32.mrf.mxu3 }
 0x29f   : > { %v1764_v41 = vadd.f32 %v1763_v11, %v1715_v4 }
 0x2a0   : > { %v1668_v16 = vpop.f32.mrf.mxu1  ;;  %2121 = vperm.xlu1 %3115, %v2095_v7  }
 0x2a1   : > { %v1669_v15 = vadd.f32 %v1668_v16, %v1620_v29  ;;  %v2008_v63 = vmax.f32 %v1764_v41, 0.0  ;;  %v4193_v29 = vpop.f32.mrf.mxu0 }
 0x2a3   : > { %1863 = vmatmul.bf16.gmra.mxu1 %v3993_v49  ;;  %1961 = vmatmul.bf16.gmra.mxu3 %v3993_v49  ;;  %v4168_v35 = vpack.c.bf16 %v2008_v63, %v2004_v27  ;;  %v2011_v36 = vmax.f32 %v1669_v15, 0.0  ;;  %v2096_v63 = vld [vmem:[%s4613_s5 + $0x28] sm:$0xff] }
 0x2a4   : > { %2126 = vperm.xlu0 %3114, %v2096_v63  }
 0x2a5   : > { %v4206_v27 = vpop.f32.mrf.mxu2 }
 0x2a6   : > { %v1766_v21 = vpop.f32.mrf.mxu3 }
 0x2a7   : > { %v1767_v34 = vadd.f32 %v1766_v21, %v1718_v43  ;;  %v2362_v43 = vld [vmem:[%s4615_s7 + $0x18] sm:$0xff]  ;;  %v2092_v21 = vld [vmem:[%s4613_s5 + $0x8] sm:$0xff] }
 0x2a8   : > { %v1670_v49 = vpop.f32.mrf.mxu1  ;;  %2384 = vperm.xlu1 %3115, %v2362_v43   ;;  %2106 = vperm.xlu2 %3116, %v2092_v21   ;;  %v2364_v21 = vld [vmem:[%s4615_s7 + $0x28] sm:$0xff] }
 0x2a9   : > { %v1671_v9 = vadd.f32 %v1670_v49, %v1622_v8  ;;  %v2012_v11 = vmax.f32 %v1767_v34, 0.0  ;;  %v1639_v33 = vpop.f32.mrf.mxu0  ;;  %v2098_v49 = vld [vmem:[%s4613_s5 + $0x38] sm:$0xff] }
 0x2aa   : > { %1834 = vmatmul.bf16.gmra.mxu0 %v4023_v40  ;;  %1932 = vmatmul.bf16.gmra.mxu2 %v4023_v40 }
 0x2ab   : > { %v2015_v17 = vmax.f32 %v1671_v9, 0.0 }
 0x2ac   : > { %2389 = vperm.xlu0 %3114, %v2363_v47  }
 0x2ad   : > { %v4188_v1 = vpack.c.bf16 %v2015_v17, %v2011_v36  ;;  %v1737_v34 = vpop.f32.mrf.mxu2  ;;  %v2365_v17 = vld [vmem:[%s4615_s7 + $0x30] sm:$0xff] }
 0x2ae   : > { %v1768_v39 = vpop.f32.mrf.mxu3 }
 0x2af   : > { %v1769_v10 = vadd.f32 %v1768_v39, %v1720_v22  ;;  %v2361_v39 = vld [vmem:[%s4615_s7 + $0x10] sm:$0xff] }
 0x2b0   : > { %v1673_v61 = vpop.f32.mrf.mxu1  ;;  %2136 = vperm.xlu1 %3115, %v2098_v49   ;;  %2369 = vperm.xlu2 %3116, %v2359_v51  }
 0x2b1   : > { %v4195_v4 = vadd.f32 %v1673_v61, %v1625_v28  ;;  %v2016_v41 = vmax.f32 %v1769_v10, 0.0  ;;  %v1641_v9 = vpop.f32.mrf.mxu0  ;;  %v2366_v61 = vld [vmem:[%s4615_s7 + $0x38] sm:$0xff] }
 0x2b3   : > { %1868 = vmatmul.bf16.gmra.mxu1 %v4013_v37  ;;  %1966 = vmatmul.bf16.gmra.mxu3 %v4013_v37  ;;  %v4204_v16 = vpack.c.bf16 %v2016_v41, %v2012_v11  ;;  %v2495_v41 = vld [vmem:[#allocation3] sm:$0x1] }
 0x2b4   : > { %2399 = vperm.xlu0 %3114, %v2365_v17   ;;  %v1640_v17 = vadd.f32 %v1639_v33, %v4035_v45 }
 0x2b5   : > { %v1739_v22 = vpop.f32.mrf.mxu2 }
 0x2b6   : > { %v1771_v15 = vpop.f32.mrf.mxu3  ;;  %v1740_v48 = vadd.f32 %v1739_v22, %v4049_v25 }
 0x2b7   : > { %v4213_v55 = vadd.f32 %v1771_v15, %v1723_v56  ;;  %v2097_v56 = vld [vmem:[%s4613_s5 + $0x30] sm:$0xff] }
 0x2b8   : > { %v4215_v37 = vpop.f32.mrf.mxu1  ;;  %2379 = vperm.xlu2 %3116, %v2361_v39  }
 0x2b9   : > { %v1800_v10 = vpop.f32.mrf.mxu0 }
 0x2bc   : > { %2404 = vperm.xlu0 %3114, %v2366_v61   ;;  %v1635_v61 = vadd.f32 %v4177_v52, %v4069_v26 }
 0x2bd   : > { %v4256_v7 = vpop.f32.mrf.mxu2 }
 0x2be   : > { %v4223_v40 = vpop.f32.mrf.mxu3 }
 0x2c0   : > { %v4228_v8 = vpop.f32.mrf.mxu1  ;;  %2131 = vperm.xlu2 %3116, %v2097_v56   ;;  %v1637_v56 = vadd.f32 %v4193_v29, %v4081_v46  ;;  %v1733_v29 = vadd.f32 %v4182_v13, %v4069_v26  ;;  %v1728_v13 = vadd.f32 %v4150_v42, %v4037_v59 }
 0x2c1   : > { %v4261_v43 = vpop.f32.mrf.mxu0 }
 0x2c3   : > { %1873 = vmatmul.bf16.gmra.mxu1 %v4033_v2  ;;  %1971 = vmatmul.bf16.gmra.mxu3 %v4033_v2  ;;  %v2311_v2 = vld [vmem:[%s4614_s6] sm:$0xff] }
 0x2c4   : > { %2315 = vperm.xlu1 %3115, %v2311_v2   ;;  %v2312_v2 = vld [vmem:[%s4614_s6 + $0x8] sm:$0xff] }
 0x2c5   : > { %v4266_v49 = vpop.f32.mrf.mxu2 }
 0x2c6   : > { %v4238_v36 = vpop.f32.mrf.mxu3 }
 0x2c8   : > { %v1680_v28 = vpop.f32.mrf.mxu1  ;;  %2394 = vperm.xlu2 %3116, %v2364_v21   ;;  %v1642_v21 = vadd.f32 %v1641_v9, %v4049_v25  ;;  %v1735_v9 = vadd.f32 %v4206_v27, %v4081_v46 }
 0x2c9   : > { %v4268_v51 = vpop.f32.mrf.mxu0 }
 0x2cc   : > { %2498 = vperm.xlu1 %3115, %v2495_v41  }
 0x2cd   : > { %v4281_v6 = vpop.f32.mrf.mxu2 }
 0x2ce   : > { %v4249_v24 = vpop.f32.mrf.mxu3 }
 0x2d0   : > { %v1683_v11 = vpop.f32.mrf.mxu1  ;;  %2320 = vperm.xlu2 %3116, %v2312_v2   ;;  %v1630_v2 = vadd.f32 %v4148_v57, %v4037_v59 }
 0x2d3   : > { %1878 = vmatmul.bf16.gmra.mxu1 %v4053_v60  ;;  %1976 = vmatmul.bf16.gmra.mxu3 %v4053_v60 }
 0x2d6   : > { %v1781_v15 = vpop.f32.mrf.mxu3 }
 0x2d8   : > { %v1685_v63 = vpop.f32.mrf.mxu1 }
 0x2d9   : > { %v1686_v31 = vadd.f32 %v1685_v63, %v1637_v56 }
 0x2db   : > { %v2039_v57 = vmax.f32 %v1686_v31, 0.0 }
 0x2de   : > { %v1783_v47 = vpop.f32.mrf.mxu3 }
 0x2e0   : > { %v1688_v60 = vpop.f32.mrf.mxu1 }
 0x2e1   : > { %v1689_v41 = vadd.f32 %v1688_v60, %v1640_v17  ;;  %v1684_v17 = vadd.f32 %v1683_v11, %v1635_v61  ;;  %v1679_v11 = vadd.f32 %v4228_v8, %v1630_v2  ;;  %v1782_v61 = vadd.f32 %v1781_v15, %v1733_v29  ;;  %v4304_v2 = vpop.f32.mrf.mxu2 }
 0x2e2   : > { %v1725_v15 = vadd.f32 %v4136_v3, %v4090_v0  ;;  %v1777_v29 = vadd.f32 %v4238_v36, %v1728_v13 }
 0x2e3   : > { %1883 = vmatmul.bf16.gmra.mxu1 %v4071_v62  ;;  %1981 = vmatmul.bf16.gmra.mxu3 %v4071_v62  ;;  %v1738_v62 = vadd.f32 %v1737_v34, %v4035_v45  ;;  %v2043_v52 = vmax.f32 %v1689_v41, 0.0  ;;  %v1681_v34 = vadd.f32 %v1680_v28, %v1632_v19  ;;  %v2035_v22 = vmax.f32 %v1684_v17, 0.0 }
 0x2e4   : > { %v1784_v19 = vadd.f32 %v1783_v47, %v1735_v9  ;;  %v1730_v28 = vadd.f32 %v4159_v50, %v4051_v14  ;;  %v2027_v8 = vmax.f32 %v1679_v11, 0.0 }
 0x2e5   : > { %v2031_v31 = vmax.f32 %v1681_v34, 0.0  ;;  %v2019_v34 = vmax.f32 %v4195_v4, 0.0 }
 0x2e6   : > { %v1786_v39 = vpop.f32.mrf.mxu3  ;;  %v2040_v47 = vmax.f32 %v1784_v19, 0.0  ;;  %v1779_v50 = vadd.f32 %v4249_v24, %v1730_v28  ;;  %v2020_v19 = vmax.f32 %v4213_v55, 0.0 }
 0x2e7   : > { %v1787_v63 = vadd.f32 %v1786_v39, %v1738_v62  ;;  %v2083_v62 = vpack.c.bf16 %v2039_v57, %v2035_v22  ;;  %v1806_v22 = vadd.f32 %v4268_v51, %v4085_v30 }
 0x2e8   : > { %v1690_v33 = vpop.f32.mrf.mxu1  ;;  %v2032_v57 = vmax.f32 %v1779_v50, 0.0 }
 0x2e9   : > { %v1691_v44 = vadd.f32 %v1690_v33, %v1642_v21  ;;  %v4293_v21 = vpop.f32.mrf.mxu0  ;;  %v1801_v33 = vadd.f32 %v1800_v10, %v4087_v18  ;;  %v2044_v41 = vmax.f32 %v1787_v63, 0.0  ;;  %v1774_v63 = vadd.f32 %v4223_v40, %v1725_v15 }
 0x2eb   : > { %v2047_v60 = vmax.f32 %v1691_v44, 0.0  ;;  %v1627_v44 = vadd.f32 %v4134_v58, %v4090_v0  ;;  %v2024_v4 = vmax.f32 %v1774_v63, 0.0 }
 0x2ed   : > { %v2087_v56 = vpack.c.bf16 %v2047_v60, %v2043_v52  ;;  %v1676_v10 = vadd.f32 %v4215_v37, %v1627_v44  ;;  %v2079_v37 = vpack.c.bf16 %v2031_v31, %v2027_v8  ;;  %v2036_v60 = vmax.f32 %v1782_v61, 0.0 }
 0x2ee   : > { %v1788_v12 = vpop.f32.mrf.mxu3  ;;  %v2076_v31 = vpack.c.bf16 %v2024_v4, %v2020_v19 }
 0x2ef   : > { %v1789_v27 = vadd.f32 %v1788_v12, %v1740_v48  ;;  %2163 = vmatpush.bf16.msrb.mxu0 %v2087_v56  ;;  %v1899_v48 = vadd.f32 %v4256_v7, %v4087_v18  ;;  %v2023_v17 = vmax.f32 %v1676_v10, 0.0  ;;  %v1803_v18 = vadd.f32 %v4261_v43, %v4099_v5 }
 0x2f0   : > { %v1849_v39 = vpop.f32.mrf.mxu1  ;;  %v2084_v24 = vpack.c.bf16 %v2040_v47, %v2036_v60  ;;  %v2028_v12 = vmax.f32 %v1777_v29, 0.0  ;;  %v1901_v43 = vadd.f32 %v4266_v49, %v4099_v5  ;;  %v1904_v5 = vadd.f32 %v4281_v6, %v4085_v30  ;;  %v4646_v29 = vld [vmem:[#allocation12_spill] sm:$0xff] }
 0x2f1   : > { %v2048_v58 = vmax.f32 %v1789_v27, 0.0  ;;  %v1850_v52 = vadd.f32 %v1849_v39, %v1801_v33  ;;  %v1810_v56 = vpop.f32.mrf.mxu0  ;;  %v2075_v44 = vpack.c.bf16 %v2023_v17, %v2019_v34  ;;  %v1908_v27 = vpop.f32.mrf.mxu2 }
 0x2f2   : > { %v2080_v13 = vpack.c.bf16 %v2032_v57, %v2028_v12 }
 0x2f3   : > { %v2088_v42 = vpack.c.bf16 %v2048_v58, %v2044_v41  ;;  %2164 = vmatpush.bf16.msrb.mxu0 %v2083_v62  ;;  %v1989_v11 = vmax.f32 %v1850_v52, 0.0 }
 0x2f5   : > { %2192 = vmatpush.bf16.msrb.mxu1 %v2088_v42 }
 0x2f6   : > { %v1947_v9 = vpop.f32.mrf.mxu3 }
 0x2f7   : > { %v1948_v7 = vadd.f32 %v1947_v9, %v1899_v48  ;;  %2165 = vmatpush.bf16.msrb.mxu0 %v2079_v37  ;;  %v1909_v9 = vadd.f32 %v1908_v27, %v4106_v53 }
 0x2f8   : > { %v1851_v3 = vpop.f32.mrf.mxu1 }
 0x2f9   : > { %v1852_v33 = vadd.f32 %v1851_v3, %v1803_v18  ;;  %2193 = vmatpush.bf16.msrb.mxu1 %v2084_v24  ;;  %v1812_v10 = vpop.f32.mrf.mxu0  ;;  %v1990_v41 = vmax.f32 %v1948_v7, 0.0  ;;  %v1910_v49 = vpop.f32.mrf.mxu2  ;;  %v4356_v7 = vld [vmem:[%s4612_s4 + $0x8] sm:$0xff] }
 0x2fb   : > { %v1993_v36 = vmax.f32 %v1852_v33, 0.0  ;;  %2166 = vmatpush.bf16.msrb.mxu0 %v2075_v44  ;;  %v4648_v44 = vld [vmem:[#allocation9_spill] sm:$0xff] }
 0x2fd   : > { %v4316_v40 = vpack.c.bf16 %v1993_v36, %v1989_v11  ;;  %2194 = vmatpush.bf16.msrb.mxu1 %v2080_v13 }
 0x2fe   : > { %v1949_v28 = vpop.f32.mrf.mxu3 }
 0x2ff   : > { %v1950_v39 = vadd.f32 %v1949_v28, %v1901_v43  ;;  %2167 = vmatpush.bf16.msrb.mxu0 %v4188_v1  ;;  %v1808_v1 = vadd.f32 %v4293_v21, %v4121_v23  ;;  %v1906_v21 = vadd.f32 %v4304_v2, %v4121_v23  ;;  %v4647_v2 = vld [vmem:[#allocation11_spill] sm:$0xff] }
 0x300   : > { %v1854_v61 = vpop.f32.mrf.mxu1  ;;  %v1813_v34 = vadd.f32 %v1812_v10, %v4647_v2 }
 0x301   : > { %v1994_v58 = vmax.f32 %v1950_v39, 0.0  ;;  %v1855_v62 = vadd.f32 %v1854_v61, %v1806_v22  ;;  %2195 = vmatpush.bf16.msrb.mxu1 %v2076_v31  ;;  %v1815_v6 = vpop.f32.mrf.mxu0  ;;  %v1913_v15 = vpop.f32.mrf.mxu2  ;;  %v4649_v61 = vld [vmem:[#allocation10_spill] sm:$0xff] }
 0x302   : > { %v1816_v12 = vadd.f32 %v1815_v6, %v4648_v44  ;;  %v1914_v28 = vadd.f32 %v1913_v15, %v4648_v44 }
 0x303   : > { %v4324_v52 = vpack.c.bf16 %v1994_v58, %v1990_v41  ;;  %2168 = vmatpush.bf16.msrb.mxu0 %v4155_v54  ;;  %v4337_v54 = vld [vmem:[%s4612_s4] sm:$0xff]  ;;  %v1997_v30 = vmax.f32 %v1855_v62, 0.0 }
 0x305   : > { %2196 = vmatpush.bf16.msrb.mxu1 %v4204_v16 }
 0x306   : > { %v1952_v55 = vpop.f32.mrf.mxu3 }
 0x307   : > { %v1953_v51 = vadd.f32 %v1952_v55, %v1904_v5  ;;  %2169 = vmatpush.bf16.msrb.mxu0 %v4132_v20  ;;  %v1811_v20 = vadd.f32 %v1810_v56, %v4106_v53  ;;  %v1911_v53 = vadd.f32 %v1910_v49, %v4647_v2  ;;  %v4373_v55 = vld [vmem:[%s4612_s4 + $0x10] sm:$0xff] }
 0x308   : > { %v1856_v8 = vpop.f32.mrf.mxu1 }
 0x309   : > { %v1857_v42 = vadd.f32 %v1856_v8, %v1808_v1  ;;  %2197 = vmatpush.bf16.msrb.mxu1 %v4168_v35  ;;  %v1998_v37 = vmax.f32 %v1953_v51, 0.0  ;;  %v1817_v23 = vpop.f32.mrf.mxu0  ;;  %v1915_v24 = vpop.f32.mrf.mxu2 }
 0x30a   : > { %v1818_v10 = vadd.f32 %v1817_v23, %v4649_v61  ;;  %v1916_v8 = vadd.f32 %v1915_v24, %v4649_v61 }
 0x30b   : > { %v2001_v16 = vmax.f32 %v1857_v42, 0.0  ;;  %2170 = vmatpush.bf16.msrb.mxu0 %v4110_v38  ;;  %v4650_v42 = vld [vmem:[#allocation8_spill] sm:$0xff] }
 0x30d   : > { %v4340_v48 = vpack.c.bf16 %v2001_v16, %v1997_v30  ;;  %2198 = vmatpush.bf16.msrb.mxu1 %v4142_v32 }
 0x30e   : > { %v1954_v35 = vpop.f32.mrf.mxu3  ;;  %2171 = vmatmul.bf16.vlgmr.msrb.gmra.mxu0 %v4337_v54 }
 0x30f   : > { %v1955_v47 = vadd.f32 %v1954_v35, %v1906_v21 }
 0x310   : > { %v1859_v50 = vpop.f32.mrf.mxu1 }
 0x311   : > { %v2002_v60 = vmax.f32 %v1955_v47, 0.0  ;;  %v1860_v17 = vadd.f32 %v1859_v50, %v1811_v20  ;;  %2199 = vmatpush.bf16.msrb.mxu1 %v4646_v29  ;;  %v1820_v36 = vpop.f32.mrf.mxu0  ;;  %v1918_v39 = vpop.f32.mrf.mxu2 }
 0x312   : > { %v1821_v6 = vadd.f32 %v1820_v36, %v4650_v42 }
 0x313   : > { %v4348_v38 = vpack.c.bf16 %v2002_v60, %v1998_v37  ;;  %v2005_v57 = vmax.f32 %v1860_v17, 0.0  ;;  %v1919_v60 = vadd.f32 %v1918_v39, %v4650_v42 }
 0x314   : > { %2200 = vmatmul.bf16.vlgmr.msrb.gmra.mxu1 %v4337_v54 }
 0x316   : > { %v1957_v32 = vpop.f32.mrf.mxu3 }
 0x317   : > { %v1958_v63 = vadd.f32 %v1957_v32, %v1909_v9  ;;  %v4393_v32 = vld [vmem:[%s4612_s4 + $0x18] sm:$0xff] }
 0x318   : > { %v1861_v56 = vpop.f32.mrf.mxu1 }
 0x319   : > { %v1862_v18 = vadd.f32 %v1861_v56, %v1813_v34  ;;  %v2006_v27 = vmax.f32 %v1958_v63, 0.0  ;;  %v4368_v62 = vpop.f32.mrf.mxu0  ;;  %v4380_v16 = vpop.f32.mrf.mxu2 }
 0x31b   : > { %v2009_v3 = vmax.f32 %v1862_v18, 0.0 }
 0x31d   : > { %v4358_v33 = vpack.c.bf16 %v2009_v3, %v2005_v57 }
 0x31e   : > { %v1959_v11 = vpop.f32.mrf.mxu3  ;;  %2176 = vmatmul.bf16.gmra.mxu0 %v4356_v7 }
 0x31f   : > { %v1960_v13 = vadd.f32 %v1959_v11, %v1911_v53 }
 0x320   : > { %v1864_v4 = vpop.f32.mrf.mxu1 }
 0x321   : > { %v2010_v43 = vmax.f32 %v1960_v13, 0.0  ;;  %v1865_v22 = vadd.f32 %v1864_v4, %v1816_v12  ;;  %v1825_v15 = vpop.f32.mrf.mxu0  ;;  %v1923_v23 = vpop.f32.mrf.mxu2 }
 0x323   : > { %v4363_v19 = vpack.c.bf16 %v2010_v43, %v2006_v27  ;;  %v2013_v49 = vmax.f32 %v1865_v22, 0.0 }
 0x324   : > { %2205 = vmatmul.bf16.gmra.mxu1 %v4356_v7 }
 0x326   : > { %v1962_v31 = vpop.f32.mrf.mxu3 }
 0x327   : > { %v1963_v41 = vadd.f32 %v1962_v31, %v1914_v28 }
 0x328   : > { %v1866_v58 = vpop.f32.mrf.mxu1 }
 0x329   : > { %v1867_v5 = vadd.f32 %v1866_v58, %v1818_v10  ;;  %v2014_v35 = vmax.f32 %v1963_v41, 0.0  ;;  %v1827_v2 = vpop.f32.mrf.mxu0  ;;  %v1925_v56 = vpop.f32.mrf.mxu2 }
 0x32a   : > { %v1828_v42 = vadd.f32 %v1827_v2, %v4051_v14 }
 0x32b   : > { %v2017_v1 = vmax.f32 %v1867_v5, 0.0 }
 0x32d   : > { %v4375_v51 = vpack.c.bf16 %v2017_v1, %v2013_v49 }
 0x32e   : > { %v1964_v30 = vpop.f32.mrf.mxu3  ;;  %2181 = vmatmul.bf16.gmra.mxu0 %v4373_v55 }
 0x32f   : > { %v1965_v21 = vadd.f32 %v1964_v30, %v1916_v8  ;;  %v1826_v8 = vadd.f32 %v1825_v15, %v4037_v59  ;;  %v1823_v15 = vadd.f32 %v4368_v62, %v4090_v0 }
 0x330   : > { %v1869_v20 = vpop.f32.mrf.mxu1 }
 0x331   : > { %v2018_v47 = vmax.f32 %v1965_v21, 0.0  ;;  %v4382_v50 = vadd.f32 %v1869_v20, %v1821_v6  ;;  %v1830_v24 = vpop.f32.mrf.mxu0  ;;  %v1928_v3 = vpop.f32.mrf.mxu2 }
 0x332   : > { %v1831_v61 = vadd.f32 %v1830_v24, %v4069_v26 }
 0x333   : > { %v4384_v37 = vpack.c.bf16 %v2018_v47, %v2014_v35 }
 0x334   : > { %2210 = vmatmul.bf16.gmra.mxu1 %v4373_v55 }
 0x336   : > { %v1967_v17 = vpop.f32.mrf.mxu3 }
 0x337   : > { %v4388_v29 = vadd.f32 %v1967_v17, %v1919_v60  ;;  %v1929_v60 = vadd.f32 %v1928_v3, %v4069_v26 }
 0x338   : > { %v1871_v9 = vpop.f32.mrf.mxu1 }
 0x339   : > { %v1832_v12 = vpop.f32.mrf.mxu0  ;;  %v1930_v36 = vpop.f32.mrf.mxu2 }
 0x33a   : > { %v1833_v10 = vadd.f32 %v1832_v12, %v4081_v46  ;;  %v1931_v17 = vadd.f32 %v1930_v36, %v4081_v46  ;;  %v1926_v46 = vadd.f32 %v1925_v56, %v4051_v14 }
 0x33e   : > { %v4395_v34 = vpop.f32.mrf.mxu3  ;;  %2186 = vmatmul.bf16.gmra.mxu0 %v4393_v32 }
 0x340   : > { %v1874_v63 = vpop.f32.mrf.mxu1 }
 0x341   : > { %v1835_v4 = vpop.f32.mrf.mxu0  ;;  %v1933_v22 = vpop.f32.mrf.mxu2 }
 0x342   : > { %v1836_v28 = vadd.f32 %v1835_v4, %v4035_v45  ;;  %v1934_v20 = vadd.f32 %v1933_v22, %v4035_v45  ;;  %v1872_v45 = vadd.f32 %v1871_v9, %v1823_v15 }
 0x344   : > { %2215 = vmatmul.bf16.gmra.mxu1 %v4393_v32 }
 0x346   : > { %v1972_v18 = vpop.f32.mrf.mxu3 }
 0x348   : > { %v1876_v57 = vpop.f32.mrf.mxu1 }
 0x349   : > { %v1837_v39 = vpop.f32.mrf.mxu0  ;;  %v1935_v6 = vpop.f32.mrf.mxu2  ;;  %v1877_v47 = vadd.f32 %v1876_v57, %v1828_v42  ;;  %v1924_v57 = vadd.f32 %v1923_v23, %v4037_v59  ;;  %v2021_v59 = vmax.f32 %v4382_v50, 0.0 }
 0x34a   : > { %v1838_v58 = vadd.f32 %v1837_v39, %v4049_v25 }
 0x34b   : > { %v2033_v26 = vmax.f32 %v1877_v47, 0.0 }
 0x34e   : > { %v1974_v53 = vpop.f32.mrf.mxu3 }
 0x350   : > { %v1879_v44 = vpop.f32.mrf.mxu1 }
 0x351   : > { %v1880_v30 = vadd.f32 %v1879_v44, %v1831_v61  ;;  %v1975_v61 = vadd.f32 %v1974_v53, %v1926_v46 }
 0x353   : > { %v2037_v44 = vmax.f32 %v1880_v30, 0.0  ;;  %v2034_v23 = vmax.f32 %v1975_v61, 0.0 }
 0x356   : > { %v1977_v11 = vpop.f32.mrf.mxu3 }
 0x357   : > { %v1978_v3 = vadd.f32 %v1977_v11, %v1929_v60 }
 0x358   : > { %v1881_v13 = vpop.f32.mrf.mxu1 }
 0x359   : > { %v1882_v49 = vadd.f32 %v1881_v13, %v1833_v10  ;;  %v1936_v13 = vadd.f32 %v1935_v6, %v4049_v25 }
 0x35b   : > { %v2041_v24 = vmax.f32 %v1882_v49, 0.0 }
 0x35d   : > { %v2085_v36 = vpack.c.bf16 %v2041_v24, %v2037_v44 }
 0x35e   : > { %v1979_v27 = vpop.f32.mrf.mxu3 }
 0x360   : > { %v1884_v43 = vpop.f32.mrf.mxu1 }
 0x361   : > { %v1885_v41 = vadd.f32 %v1884_v43, %v1836_v28  ;;  %v1875_v43 = vadd.f32 %v1874_v63, %v1826_v8  ;;  %v1980_v28 = vadd.f32 %v1979_v27, %v1931_v17  ;;  %v1921_v63 = vadd.f32 %v4380_v16, %v4090_v0 }
 0x362   : > { %v2025_v27 = vmax.f32 %v1872_v45, 0.0  ;;  %v2022_v0 = vmax.f32 %v4388_v29, 0.0 }
 0x363   : > { %v2045_v21 = vmax.f32 %v1885_v41, 0.0  ;;  %v2029_v25 = vmax.f32 %v1875_v43, 0.0  ;;  %v2042_v10 = vmax.f32 %v1980_v28, 0.0  ;;  %v1973_v41 = vadd.f32 %v1972_v18, %v1924_v57 }
 0x364   : > { %v1970_v14 = vadd.f32 %v4395_v34, %v1921_v63  ;;  %v2077_v11 = vpack.c.bf16 %v2025_v27, %v2021_v59 }
 0x365   : > { %v2081_v9 = vpack.c.bf16 %v2033_v26, %v2029_v25  ;;  %v2030_v53 = vmax.f32 %v1973_v41, 0.0 }
 0x366   : > { %v1982_v31 = vpop.f32.mrf.mxu3 }
 0x367   : > { %v1983_v12 = vadd.f32 %v1982_v31, %v1934_v20  ;;  %v2082_v49 = vpack.c.bf16 %v2034_v23, %v2030_v53 }
 0x368   : > { %v1886_v5 = vpop.f32.mrf.mxu1 }
 0x369   : > { %v1887_v1 = vadd.f32 %v1886_v5, %v1838_v58  ;;  %v2046_v22 = vmax.f32 %v1983_v12, 0.0  ;;  %v2038_v58 = vmax.f32 %v1978_v3, 0.0  ;;  %v2026_v5 = vmax.f32 %v1970_v14, 0.0 }
 0x36b   : > { %v2049_v35 = vmax.f32 %v1887_v1, 0.0  ;;  %v2086_v56 = vpack.c.bf16 %v2042_v10, %v2038_v58  ;;  %v2078_v16 = vpack.c.bf16 %v2026_v5, %v2022_v0 }
 0x36d   : > { %v2089_v4 = vpack.c.bf16 %v2049_v35, %v2045_v21 }
 0x36e   : > { %v1984_v2 = vpop.f32.mrf.mxu3 }
 0x36f   : > { %v1985_v39 = vadd.f32 %v1984_v2, %v1936_v13  ;;  %2221 = vmatpush.bf16.msrb.mxu2 %v2089_v4 }
 0x371   : > { %v2050_v31 = vmax.f32 %v1985_v39, 0.0 }
 0x373   : > { %v2090_v62 = vpack.c.bf16 %v2050_v31, %v2046_v22  ;;  %2222 = vmatpush.bf16.msrb.mxu2 %v2085_v36 }
 0x375   : > { %2250 = vmatpush.bf16.msrb.mxu3 %v2090_v62 }
 0x377   : > { %2223 = vmatpush.bf16.msrb.mxu2 %v2081_v9 }
 0x379   : > { %2251 = vmatpush.bf16.msrb.mxu3 %v2086_v56 }
 0x37b   : > { %2224 = vmatpush.bf16.msrb.mxu2 %v2077_v11 }
 0x37d   : > { %2252 = vmatpush.bf16.msrb.mxu3 %v2082_v49 }
 0x37f   : > { %2225 = vmatpush.bf16.msrb.mxu2 %v4375_v51  ;;  %v4434_v51 = vpop.permute.xlu2 %2106 }
 0x381   : > { %2253 = vmatpush.bf16.msrb.mxu3 %v2078_v16 }
 0x383   : > { %2226 = vmatpush.bf16.msrb.mxu2 %v4358_v33 }
 0x385   : > { %2254 = vmatpush.bf16.msrb.mxu3 %v4384_v37 }
 0x387   : > { %2227 = vmatpush.bf16.msrb.mxu2 %v4340_v48  ;;  %v4440_v29 = vpop.permute.xlu2 %2369 }
 0x389   : > { %2255 = vmatpush.bf16.msrb.mxu3 %v4363_v19 }
 0x38b   : > { %2228 = vmatpush.bf16.msrb.mxu2 %v4316_v40  ;;  %v2172_v48 = vpop.f32.mrf.mxu0 }
 0x38d   : > { %2256 = vmatpush.bf16.msrb.mxu3 %v4348_v38 }
 0x38e   : > { %2229 = vmatmul.bf16.vlgmr.msrb.gmra.mxu2 %v4337_v54 }
 0x38f   : > { %v4446_v1 = vpop.permute.xlu2 %2379 }
 0x391   : > { %2257 = vmatpush.bf16.msrb.mxu3 %v4324_v52  ;;  %v2201_v40 = vpop.f32.mrf.mxu1 }
 0x393   : > { %v2174_v33 = vpop.f32.mrf.mxu0 }
 0x394   : > { %2258 = vmatmul.bf16.vlgmr.msrb.gmra.mxu3 %v4337_v54  ;;  %v4436_v54 = vpop.permute.xlu0 %2111  ;;  %v2175_v43 = vadd.f32 %v2174_v33, %v4434_v51 }
 0x396   : > { %v2283_v61 = vmax.f32 %v2175_v43, 0.0 }
 0x397   : > { %v4454_v20 = vpop.permute.xlu2 %2131 }
 0x399   : > { %v2203_v38 = vpop.f32.mrf.mxu1 }
 0x39a   : > { %v2204_v17 = vadd.f32 %v2203_v38, %v4434_v51 }
 0x39b   : > { %v2177_v52 = vpop.f32.mrf.mxu0 }
 0x39c   : > { %v2284_v15 = vmax.f32 %v2204_v17, 0.0  ;;  %v2178_v46 = vadd.f32 %v2177_v52, %v4436_v54 }
 0x39e   : > { %2234 = vmatmul.bf16.gmra.mxu2 %v4356_v7  ;;  %v2287_v23 = vmax.f32 %v2178_v46, 0.0 }
 0x39f   : > { %v4476_v31 = vpop.permute.xlu2 %2394 }
 0x3a1   : > { %v2206_v19 = vpop.f32.mrf.mxu1 }
 0x3a2   : > { %v2207_v13 = vadd.f32 %v2206_v19, %v4436_v54 }
 0x3a3   : > { %v2179_v37 = vpop.f32.mrf.mxu0 }
 0x3a4   : > { %2263 = vmatmul.bf16.gmra.mxu3 %v4356_v7  ;;  %v4438_v7 = vpop.permute.xlu1 %2101  ;;  %v2288_v39 = vmax.f32 %v2207_v13, 0.0 }
 0x3a5   : > { %v2202_v4 = vadd.f32 %v2201_v40, %v4438_v7  ;;  %v2173_v26 = vadd.f32 %v2172_v48, %v4438_v7 }
 0x3a6   : > { %v2416_v41 = vmul.f32 %v4446_v1, %v2288_v39 }
 0x3a7   : > { %v2280_v28 = vmax.f32 %v2202_v4, 0.0  ;;  %v2279_v14 = vmax.f32 %v2173_v26, 0.0  ;;  %v2321_v39 = vpop.permute.xlu2 %2320 }
 0x3a9   : > { %v2208_v50 = vpop.f32.mrf.mxu1  ;;  %v2408_v27 = vmul.f32 %v4440_v29, %v2280_v28  ;;  %v2407_v52 = vmul.f32 %v4440_v29, %v2279_v14 }
 0x3ab   : > { %v2182_v18 = vpop.f32.mrf.mxu0 }
 0x3ae   : > { %2239 = vmatmul.bf16.gmra.mxu2 %v4373_v55 }
 0x3b1   : > { %v2211_v34 = vpop.f32.mrf.mxu1 }
 0x3b3   : > { %v2184_v21 = vpop.f32.mrf.mxu0 }
 0x3b4   : > { %2268 = vmatmul.bf16.gmra.mxu3 %v4373_v55  ;;  %v4442_v55 = vpop.permute.xlu0 %2374 }
 0x3b5   : > { %v2412_v3 = vmul.f32 %v4442_v55, %v2284_v15  ;;  %v2411_v16 = vmul.f32 %v4442_v55, %v2283_v61  ;;  %v3133_v61 = vld [vmem:[%s3324_s10 + $0x8] sm:$0xff] }
 0x3b7   : > { %v2452_v11 = vadd.f32 %v2412_v3, %v2408_v27 }
 0x3b9   : > { %v2213_v42 = vpop.f32.mrf.mxu1  ;;  %v2453_v40 = vadd.f32 %v2452_v11, %v2416_v41 }
 0x3bb   : > { %v2187_v44 = vpop.f32.mrf.mxu0 }
 0x3bc   : > { %v4448_v8 = vpop.permute.xlu0 %2126 }
 0x3bd   : > { %v2214_v22 = vadd.f32 %v2213_v42, %v4448_v8  ;;  %v2185_v48 = vadd.f32 %v2184_v21, %v4448_v8  ;;  %v2188_v42 = vadd.f32 %v2187_v44, %v4454_v20  ;;  %v2439_v21 = vadd.f32 %v2411_v16, %v2407_v52 }
 0x3be   : > { %2244 = vmatmul.bf16.gmra.mxu2 %v4393_v32 }
 0x3bf   : > { %v2300_v5 = vmax.f32 %v2214_v22, 0.0  ;;  %v2299_v15 = vmax.f32 %v2185_v48, 0.0  ;;  %v2303_v46 = vmax.f32 %v2188_v42, 0.0  ;;  %v3137_v42 = vld [vmem:[%s3324_s10 + $0x10] sm:$0xff] }
 0x3c1   : > { %v2216_v60 = vpop.f32.mrf.mxu1 }
 0x3c2   : > { %v2217_v59 = vadd.f32 %v2216_v60, %v4454_v20  ;;  %v2428_v60 = vmul.f32 %v4476_v31, %v2300_v5 }
 0x3c4   : > { %2273 = vmatmul.bf16.gmra.mxu3 %v4393_v32  ;;  %v4444_v32 = vpop.permute.xlu1 %2116  ;;  %v4458_v47 = vpop.permute.xlu0 %2389  ;;  %v2304_v33 = vmax.f32 %v2217_v59, 0.0 }
 0x3c5   : > { %v2209_v2 = vadd.f32 %v2208_v50, %v4444_v32  ;;  %v2180_v10 = vadd.f32 %v2179_v37, %v4444_v32  ;;  %v2415_v37 = vmul.f32 %v4446_v1, %v2287_v23 }
 0x3c7   : > { %v2292_v36 = vmax.f32 %v2209_v2, 0.0  ;;  %v2291_v0 = vmax.f32 %v2180_v10, 0.0 }
 0x3c9   : > { %v2218_v63 = vpop.f32.mrf.mxu1 }
 0x3cc   : > { %v4450_v6 = vpop.permute.xlu1 %2121  ;;  %v4481_v62 = vpop.permute.xlu0 %2399 }
 0x3cd   : > { %v2212_v45 = vadd.f32 %v2211_v34, %v4450_v6  ;;  %v2183_v56 = vadd.f32 %v2182_v18, %v4450_v6  ;;  %v2189_v34 = vpop.f32.mrf.mxu0  ;;  %v2432_v43 = vmul.f32 %v4481_v62, %v2304_v33  ;;  %v2431_v11 = vmul.f32 %v4481_v62, %v2303_v46  ;;  %v3136_v33 = vld [vmem:[%s3324_s10 + $0x20] sm:$0xff] }
 0x3ce   : > { %v2327_v52 = vmul.f32 %v3136_v33, %v2321_v39 }
 0x3cf   : > { %v2296_v9 = vmax.f32 %v2212_v45, 0.0  ;;  %v2295_v50 = vmax.f32 %v2183_v56, 0.0  ;;  %v2440_v45 = vadd.f32 %v2439_v21, %v2415_v37 }
 0x3d1   : > { %v2424_v38 = vmul.f32 %v4458_v47, %v2296_v9  ;;  %v2423_v44 = vmul.f32 %v4458_v47, %v2295_v50  ;;  %v2427_v9 = vmul.f32 %v4476_v31, %v2299_v15 }
 0x3d4   : > { %v4461_v24 = vpop.permute.xlu1 %2384  ;;  %v4503_v26 = vpop.permute.xlu0 %2404 }
 0x3d5   : > { %v2420_v53 = vmul.f32 %v4461_v24, %v2292_v36  ;;  %v2419_v13 = vmul.f32 %v4461_v24, %v2291_v0 }
 0x3d7   : > { %v2454_v18 = vadd.f32 %v2453_v40, %v2420_v53  ;;  %v2441_v41 = vadd.f32 %v2440_v45, %v2419_v13  ;;  %v3135_v40 = vld [vmem:[%s3324_s10] sm:$0xff] }
 0x3d9   : > { %v2455_v2 = vadd.f32 %v2454_v18, %v2424_v38  ;;  %v2442_v56 = vadd.f32 %v2441_v41, %v2423_v44  ;;  %v3140_v44 = vld [vmem:[%s3324_s10 + $0x38] sm:$0xff] }
 0x3da   : > { %v2330_v46 = vmul.f32 %v3140_v44, %v2321_v39 }
 0x3db   : > { %v2456_v3 = vadd.f32 %v2455_v2, %v2428_v60 }
 0x3dc   : > { %v4485_v58 = vpop.permute.xlu1 %2136 }
 0x3dd   : > { %v2219_v49 = vadd.f32 %v2218_v63, %v4485_v58  ;;  %v2190_v28 = vadd.f32 %v2189_v34, %v4485_v58  ;;  %v3134_v63 = vld [vmem:[%s3324_s10 + $0x28] sm:$0xff]  ;;  %v2457_v59 = vadd.f32 %v2456_v3, %v2432_v43 }
 0x3de   : > { %v2328_v27 = vmul.f32 %v3134_v63, %v2321_v39 }
 0x3df   : > { %v2308_v17 = vmax.f32 %v2219_v49, 0.0  ;;  %v2307_v14 = vmax.f32 %v2190_v28, 0.0  ;;  %v2443_v49 = vadd.f32 %v2442_v56, %v2427_v9  ;;  %v3139_v28 = vld [vmem:[%s3324_s10 + $0x18] sm:$0xff] }
 0x3e1   : > { %v2436_v22 = vmul.f32 %v4503_v26, %v2308_v17  ;;  %v2435_v0 = vmul.f32 %v4503_v26, %v2307_v14  ;;  %v2444_v38 = vadd.f32 %v2443_v49, %v2431_v11  ;;  %v3138_v17 = vld [vmem:[%s3324_s10 + $0x30] sm:$0xff]  ;;  %s2648_s10 = sshll.u32 %s3318_s29, 2 }
 0x3e2   : > { %v2329_v21 = vmul.f32 %v3138_v17, %v2321_v39  ;;  %s374_s8 = scalar_lea.vmem [#allocation5], %s2648_s10  ;;  %s3161_s10 = scalar_lea.hbm %s4617_s9, 8 }
 0x3e3   : > { %v2458_v53 = vadd.f32 %v2457_v59, %v2436_v22  ;;  %v2445_v37 = vadd.f32 %v2444_v38, %v2435_v0  ;;  %s2574_s15 = sshll.u32 %s374_s8, 4  ;;  %p3163_p3 = scmp.lt.s32.totalorder %s3161_s10, %s3157_s23  ;;  %s2575_s15 = int_to_ptr.vmem [resolvable:$true] %s2574_s15 }
 0x3e4   : > { %v2316_v36 = vpop.permute.xlu1 %2315 }
 0x3e5   : > { %v2324_v10 = vmul.f32 %v3133_v61, %v2316_v36  ;;  %v2323_v48 = vmul.f32 %v3135_v40, %v2316_v36  ;;  %v2459_v50 = vrot.slane %v2458_v53, 4  ;;  %v2325_v60 = vmul.f32 %v3137_v42, %v2316_v36  ;;  %p3164_p4 = por %p3163_p3, %p3162_p2 }
 0x3e6   : > { %v2326_v45 = vmul.f32 %v3139_v28, %v2316_v36  ;;  %v2446_v61 = vrot.slane %v2445_v37, 4 }
 0x3e7   : > { %v2338_v16 = vadd.f32 %v2328_v27, %v2324_v10  ;;  %v2331_v15 = vadd.f32 %v2327_v52, %v2323_v48  ;;  %v2460_v2 = vadd.f32 %v2459_v50, %v2458_v53  ;;  %v4524_v63 = vadd.f32 %v2329_v21, %v2325_v60  ;;  %p3165_p5 = pnand %p3164_p4, %p3160_p1 }
 0x3e8   : > { %v4529_v59 = vadd.f32 %v2330_v46, %v2326_v45  ;;  %v2447_v56 = vadd.f32 %v2446_v61, %v2445_v37 }
 0x3e9   : > { %v2339_v34 = vrot.slane %v2338_v16, 4  ;;  %v2332_v41 = vrot.slane %v2331_v15, 4  ;;  %v2461_v9 = vrot.slane %v2460_v2, 2  ;;  %v2346_v49 = vrot.slane %v4524_v63, 4 }
 0x3eb   : > { %v2340_v10 = vadd.f32 %v2339_v34, %v2338_v16  ;;  %v2333_v16 = vadd.f32 %v2332_v41, %v2331_v15  ;;  %v2462_v40 = vadd.f32 %v2461_v9, %v2460_v2 }
 0x3ed   : > { %v2334_v21 = vrot.slane %v2333_v16, 2 }
 0x411   : > { %v4452_v30 = vpop.f32.mrf.mxu2 }
 0x412   : > { %v2231_v3 = vadd.f32 %v4452_v30, %v4438_v7 }
 0x414   : > { %v2281_v39 = vmax.f32 %v2231_v3, 0.0 }
 0x416   : > { %v2409_v33 = vmul.f32 %v4440_v29, %v2281_v39 }
 0x417   : > { %v4456_v35 = vpop.f32.mrf.mxu3 }
 0x418   : > { %v2260_v11 = vadd.f32 %v4456_v35, %v4438_v7 }
 0x419   : > { %v4463_v12 = vpop.f32.mrf.mxu2 }
 0x41a   : > { %v2233_v13 = vadd.f32 %v4463_v12, %v4434_v51  ;;  %v2282_v50 = vmax.f32 %v2260_v11, 0.0 }
 0x41c   : > { %v2285_v27 = vmax.f32 %v2233_v13, 0.0  ;;  %v2410_v46 = vmul.f32 %v4440_v29, %v2282_v50 }
 0x41e   : > { %v2413_v0 = vmul.f32 %v4442_v55, %v2285_v27 }
 0x41f   : > { %v4470_v57 = vpop.f32.mrf.mxu3 }
 0x420   : > { %v2262_v36 = vadd.f32 %v4470_v57, %v4434_v51  ;;  %v2465_v34 = vadd.f32 %v2413_v0, %v2409_v33 }
 0x421   : > { %v4478_v25 = vpop.f32.mrf.mxu2 }
 0x422   : > { %v2236_v22 = vadd.f32 %v4478_v25, %v4436_v54  ;;  %v2341_v25 = vrot.slane %v2340_v10, 2  ;;  %v2286_v48 = vmax.f32 %v2262_v36, 0.0 }
 0x424   : > { %v2289_v14 = vmax.f32 %v2236_v22, 0.0  ;;  %v2342_v52 = vadd.f32 %v2341_v25, %v2340_v10  ;;  %v2335_v10 = vadd.f32 %v2334_v21, %v2333_v16  ;;  %v2499_v25 = vpop.permute.xlu1 %2498 }
 0x426   : > { %v2417_v7 = vmul.f32 %v4446_v1, %v2289_v14  ;;  %v2343_v44 = vrot.slane %v2342_v52, 1  ;;  %v2336_v0 = vrot.slane %v2335_v10, 1 }
 0x427   : > { %v4494_v19 = vpop.f32.mrf.mxu3 }
 0x428   : > { %v2265_v53 = vadd.f32 %v4494_v19, %v4436_v54  ;;  %v2448_v19 = vrot.slane %v2447_v56, 2  ;;  %v2466_v15 = vadd.f32 %v2465_v34, %v2417_v7  ;;  %v2344_v14 = vadd.f32 %v2343_v44, %v2342_v52 }
 0x429   : > { %v2237_v4 = vpop.f32.mrf.mxu2 }
 0x42a   : > { %v2238_v12 = vadd.f32 %v2237_v4, %v4444_v32  ;;  %v2290_v37 = vmax.f32 %v2265_v53, 0.0  ;;  %v2449_v45 = vadd.f32 %v2448_v19, %v2447_v56 }
 0x42c   : > { %v2293_v51 = vmax.f32 %v2238_v12, 0.0  ;;  %v2418_v3 = vmul.f32 %v4446_v1, %v2290_v37  ;;  %v2450_v1 = vrot.slane %v2449_v45, 1 }
 0x42e   : > { %v2421_v42 = vmul.f32 %v4461_v24, %v2293_v51 }
 0x42f   : > { %v2266_v23 = vpop.f32.mrf.mxu3 }
 0x431   : > { %v2240_v5 = vpop.f32.mrf.mxu2 }
 0x432   : > { %v2241_v30 = vadd.f32 %v2240_v5, %v4450_v6  ;;  %v2267_v5 = vadd.f32 %v2266_v23, %v4444_v32  ;;  %v2463_v32 = vrot.slane %v2462_v40, 1  ;;  %v2414_v23 = vmul.f32 %v4442_v55, %v2286_v48 }
 0x434   : > { %v2297_v35 = vmax.f32 %v2241_v30, 0.0  ;;  %v2294_v13 = vmax.f32 %v2267_v5, 0.0  ;;  %v2464_v27 = vadd.f32 %v2463_v32, %v2462_v40  ;;  %v2478_v12 = vadd.f32 %v2414_v23, %v2410_v46 }
 0x435   : > { %v2347_v30 = vadd.f32 %v2346_v49, %v4524_v63  ;;  %v2451_v5 = vadd.f32 %v2450_v1, %v2449_v45  ;;  %v2501_v63 = vperm.slane %v2499_v25, 0 }
 0x436   : > { %v2425_v2 = vmul.f32 %v4458_v47, %v2297_v35  ;;  %v2422_v41 = vmul.f32 %v4461_v24, %v2294_v13  ;;  %v2479_v56 = vadd.f32 %v2478_v12, %v2418_v3  ;;  %v2353_v24 = vrot.slane %v4529_v59, 4 }
 0x437   : > { %v2269_v18 = vpop.f32.mrf.mxu3  ;;  %v2492_v51 = vadd.f32 %v2464_v27, %v2344_v14 }
 0x438   : > { %v2270_v60 = vadd.f32 %v2269_v18, %v4450_v6  ;;  %v2467_v6 = vadd.f32 %v2466_v15, %v2421_v42  ;;  %v2354_v19 = vadd.f32 %v2353_v24, %v4529_v59 }
 0x439   : > { %v2242_v43 = vpop.f32.mrf.mxu2  ;;  %v4563_v52 = vadd.f32 %v2501_v63, %v2492_v51 }
 0x43a   : > { %v2243_v57 = vadd.f32 %v2242_v43, %v4448_v8  ;;  %v2298_v18 = vmax.f32 %v2270_v60, 0.0  ;;  %v2468_v9 = vadd.f32 %v2467_v6, %v2425_v2  ;;  %v2355_v32 = vrot.slane %v2354_v19, 2 }
 0x43b   : > { %vm2531_vm5 = vcmp.ge.f32.partialorder %v4563_v52, 0.0 }
 0x43c   : > { %v2301_v17 = vmax.f32 %v2243_v57, 0.0  ;;  %v2480_v57 = vadd.f32 %v2479_v56, %v2422_v41 }
 0x43e   : > { %v2429_v61 = vmul.f32 %v4476_v31, %v2301_v17 }
 0x43f   : > { %v2271_v4 = vpop.f32.mrf.mxu3 }
 0x440   : > { %v2272_v43 = vadd.f32 %v2271_v4, %v4448_v8  ;;  %v2469_v11 = vadd.f32 %v2468_v9, %v2429_v61 }
 0x441   : > { %v2245_v38 = vpop.f32.mrf.mxu2 }
 0x442   : > { %v2246_v54 = vadd.f32 %v2245_v38, %v4454_v20  ;;  %v2302_v36 = vmax.f32 %v2272_v43, 0.0  ;;  %v2348_v38 = vrot.slane %v2347_v30, 2  ;;  %v2356_v43 = vadd.f32 %v2355_v32, %v2354_v19 }
 0x444   : > { %v2305_v28 = vmax.f32 %v2246_v54, 0.0  ;;  %v2430_v16 = vmul.f32 %v4476_v31, %v2302_v36  ;;  %v2337_v54 = vadd.f32 %v2336_v0, %v2335_v10  ;;  %v2349_v42 = vadd.f32 %v2348_v38, %v2347_v30 }
 0x446   : > { %v2433_v39 = vmul.f32 %v4481_v62, %v2305_v28  ;;  %v2491_v34 = vadd.f32 %v2451_v5, %v2337_v54  ;;  %v2350_v15 = vrot.slane %v2349_v42, 1 }
 0x447   : > { %v2274_v22 = vpop.f32.mrf.mxu3 }
 0x448   : > { %v2275_v55 = vadd.f32 %v2274_v22, %v4454_v20  ;;  %v2426_v20 = vmul.f32 %v4458_v47, %v2298_v18  ;;  %v2470_v40 = vadd.f32 %v2469_v11, %v2433_v39  ;;  %v2351_v3 = vadd.f32 %v2350_v15, %v2349_v42 }
 0x449   : > { %v2247_v8 = vpop.f32.mrf.mxu2 }
 0x44a   : > { %v2248_v29 = vadd.f32 %v2247_v8, %v4485_v58  ;;  %v2306_v53 = vmax.f32 %v2275_v55, 0.0  ;;  %v2481_v33 = vadd.f32 %v2480_v57, %v2426_v20 }
 0x44c   : > { %v2309_v4 = vmax.f32 %v2248_v29, 0.0  ;;  %v2434_v47 = vmul.f32 %v4481_v62, %v2306_v53  ;;  %v2482_v50 = vadd.f32 %v2481_v33, %v2430_v16  ;;  %v2507_v62 = vand.u32 2147483647, %v4563_v52 }
 0x44e   : > { %v2437_v48 = vmul.f32 %v4503_v26, %v2309_v4  ;;  %v2483_v60 = vadd.f32 %v2482_v50, %v2434_v47  ;;  %v2511_v28 = vsub.f32 0.0, %v2507_v62 }
 0x44f   : > { %v2276_v49 = vpop.f32.mrf.mxu3 }
 0x450   : > { %v2471_v7 = vadd.f32 %v2470_v40, %v2437_v48  ;;  %v2277_v35 = vadd.f32 %v2276_v49, %v4485_v58  ;;  %v4567_v58 = vadd.f32 %v2501_v63, %v2491_v34  ;;  %v2516_v18 = vmul.f32 1.442695, %v2511_v28 }
 0x452   : > { %v2472_v31 = vrot.slane %v2471_v7, 4  ;;  %v2310_v37 = vmax.f32 %v2277_v35, 0.0  ;;  %v2506_v46 = vand.u32 2147483647, %v4567_v58  ;;  %3117 = vpow2.f32 %v2516_v18 }
 0x453   : > { %vm2530_vm10 = vcmp.ge.f32.partialorder %v4567_v58, 0.0 }
 0x454   : > { %v2473_v17 = vadd.f32 %v2472_v31, %v2471_v7  ;;  %v2438_v21 = vmul.f32 %v4503_v26, %v2310_v37  ;;  %v2357_v26 = vrot.slane %v2356_v43, 1  ;;  %v2510_v10 = vsub.f32 0.0, %v2506_v46 }
 0x455   : > { %v4651_v31 = vlaneseq }
 0x456   : > { %v2474_v23 = vrot.slane %v2473_v17, 2  ;;  %v2484_v13 = vadd.f32 %v2483_v60, %v2438_v21  ;;  %v2358_v41 = vadd.f32 %v2357_v26, %v2356_v43  ;;  %v2514_v36 = vmul.f32 1.442695, %v2510_v10 }
 0x457   : > { %vm2558_vm12 = vcmp.lt.s32.totalorder %v4651_v31, 512 }
 0x458   : > { %v2475_v59 = vadd.f32 %v2474_v23, %v2473_v17  ;;  %v2485_v2 = vrot.slane %v2484_v13, 4  ;;  %3119 = vpow2.f32 %v2514_v36  ;;  %v3118_v30 = vpop.eup %3117 }
 0x459   : > { %v2523_v20 = vadd.f32 1.0, %v3118_v30 }
 0x45a   : > { %v2476_v45 = vrot.slane %v2475_v59, 1  ;;  %v2486_v44 = vadd.f32 %v2485_v2, %v2484_v13 }
 0x45c   : > { %v2477_v22 = vadd.f32 %v2476_v45, %v2475_v59  ;;  %v2487_v6 = vrot.slane %v2486_v44, 2 }
 0x45e   : > { %v2493_v61 = vadd.f32 %v2477_v22, %v2351_v3  ;;  %v2488_v55 = vadd.f32 %v2487_v6, %v2486_v44  ;;  %v3120_v53 = vpop.eup %3119 }
 0x45f   : > { %v2522_v24 = vadd.f32 1.0, %v3120_v53 }
 0x460   : > { %v2504_v27 = vadd.f32 %v2501_v63, %v2493_v61  ;;  %v2489_v12 = vrot.slane %v2488_v55, 1 }
 0x462   : > { %v2508_v8 = vand.u32 2147483647, %v2504_v27  ;;  %v2490_v9 = vadd.f32 %v2489_v12, %v2488_v55  ;;  %vm2532_vm6 = vcmp.ge.f32.partialorder %v2504_v27, 0.0 }
 0x464   : > { %v2512_v39 = vsub.f32 0.0, %v2508_v8  ;;  %v2494_v29 = vadd.f32 %v2490_v9, %v2358_v41 }
 0x466   : > { %v2518_v1 = vmul.f32 1.442695, %v2512_v39  ;;  %v2505_v14 = vadd.f32 %v2501_v63, %v2494_v29 }
 0x468   : > { %3121 = vpow2.f32 %v2518_v1  ;;  %v2509_v56 = vand.u32 2147483647, %v2505_v14  ;;  %vm2533_vm7 = vcmp.ge.f32.partialorder %v2505_v14, 0.0 }
 0x46a   : > { %v2513_v25 = vsub.f32 0.0, %v2509_v56 }
 0x46c   : > { %v2520_v11 = vmul.f32 1.442695, %v2513_v25 }
 0x46e   : > { %v3122_v4 = vpop.eup %3121  ;;  %3123 = vpow2.f32 %v2520_v11 }
 0x46f   : > { %3125 = vrcp.f32 %v2523_v20  ;;  %v2524_v0 = vadd.f32 1.0, %v3122_v4 }
 0x471   : > { %3127 = vrcp.f32 %v2524_v0 }
 0x472   : > { %3129 = vrcp.f32 %v2522_v24 }
 0x474   : > { %v3124_v51 = vpop.eup %3123 }
 0x475   : > { %v3126_v57 = vpop.eup %3125  ;;  %v2525_v16 = vadd.f32 1.0, %v3124_v51 }
 0x476   : > { %v2535_v48 = vmul.f32 %v3126_v57, %v3118_v30 }
 0x477   : > { %v3128_v40 = vpop.eup %3127  ;;  %3131 = vrcp.f32 %v2525_v16 }
 0x478   : > { %v2536_v5 = vmul.f32 %v3128_v40, %v3122_v4  ;;  %v3130_v38 = vpop.eup %3129  ;;  %v2539_v63 = vsel %vm2531_vm5, %v3126_v57, %v2535_v48 }
 0x479   : > { %v2534_v33 = vmul.f32 %v3130_v38, %v3120_v53  ;;  %v2546_v35 = vrot.slane %v2539_v63, 7 }
 0x47a   : > { %v2540_v7 = vsel %vm2532_vm6, %v3128_v40, %v2536_v5 }
 0x47b   : > { %v2547_v19 = vrot.slane %v2540_v7, 6  ;;  %v2538_v50 = vsel %vm2530_vm10, %v3130_v38, %v2534_v33 }
 0x47c   : > { %v2550_v37 = vsel %vm2549_vm8, %v2538_v50, %v2546_v35 }
 0x47d   : > { %v3132_v49 = vpop.eup %3131 }
 0x47e   : > { %v2537_v47 = vmul.f32 %v3132_v49, %v3124_v51 }
 0x480   : > { %v2541_v54 = vsel %vm2533_vm7, %v3132_v49, %v2537_v47 }
 0x481   : > { %v2548_v52 = vrot.slane %v2541_v54, 5 }
 0x483   : > { %v2552_v34 = vsel %vm2551_vm9, %v2547_v19, %v2548_v52 }
 0x484   : > { %v2554_v42 = vsel %vm2553_vm11, %v2550_v37, %v2552_v34 }
 0x485   : > { %2560 = vst.msk [vmem:[%s374_s8] sm:$0xf] %vm2558_vm12, %v2554_v42 }
 0x486   : > { %3168 = shalt.err (!%p3165_p5)
}
 0x487   : > { %3072 = dma.vmem_to_hbm [thread:$0]  (%p3299_p6), %s2575_s15, 64, %s2577_s17, %s2562_s18  }
 0x488 PF: > { %s2588_s29 = sand.u32 1, %s3191_s11   ;;  %p3075_p7 = pnand %p2644_p9, %p3303_p8 }
 0x489   : > { %s2589_s28 = scalar_lea.sflag [#allocation6], %s2588_s29 }
 0x48a   : > { %p3076_p10 = pneg %p3075_p7 }
 0x48c   : > { %3186 = dma.done.wait (%p3076_p10), %s2589_s28, 64  }
 0x48d   : > { %3188 = vsyncadd (%p3076_p10), %s2589_s28, 4294967232  ;;  %p21_p11 = scmp.ge.s32.totalorder %s3284_s16, 4   ;;  %s4652_s11 = smov %s3195_s12 }
 0x48e   : > { %s4653_s12 = smov %s3199_s13  ;;  %s4654_s13 = smov %s3297_s19 }
 0x48f   : > { %s4655_s14 = smov %s3284_s16  ;;  %23 = sbr.rel (!%p21_p11) target bundleno = 6 (0x6), region = 119 }
 0x494   :  { %2595 = vsyncpa [#allocation6], 1 }
 0x495   :  { %2597 = vsyncpa [#allocation6 + $0x1], 1 }

</bundles_post_ra>
